<compile_context>
chip_gen: v5e
topology: v5e:2x2
jax: 0.10.0
libtpu: 0.0.40
codegen_flags: <defaults>
</compile_context>

<pallas_src>
import jax
import jax.numpy as jnp
from jax.experimental import pallas as pl
from jax.experimental.pallas import tpu as pltpu

EPS = 1e-12  # matches F.normalize(eps=1e-12): x / clamp_min(||x||, eps)


def _l2norm_fast(x):
    # x * rsqrt(max(sum(x^2), eps^2)) == x / max(||x||, eps)   (sqrt is monotone)
    s = jnp.sum(x * x, axis=-1, keepdims=True)
    return x * jax.lax.rsqrt(jnp.maximum(s, EPS * EPS))


def _l2norm_ref(x):
    n = jnp.sqrt(jnp.sum(x * x, axis=-1, keepdims=True))
    return x / jnp.maximum(n, EPS)


def ktn_kernel(scale_ref, bias_ref, ids_ref, fq_ref, wbT_ref, fs_ref, labT_ref, out_ref):
    Bt, Qp, F = fq_ref.shape
    nKaP = wbT_ref.shape[1]      # padded nKall      (multiple of 128)
    nKbP = ids_ref.shape[2]      # padded nKbase     (multiple of 128)
    nKnP = labT_ref.shape[1]     # padded nKnovel    (multiple of 128)
    mdt = wbT_ref.dtype          # matmul operand dtype (bf16 by default, f32 optional)

    scale = scale_ref[0]
    bias = bias_ref[0]

    # ---- base-class cosine scores: ONE tall MXU matmul across the whole batch block -------
    fq_all = fq_ref[...].reshape(Bt * Qp, F)                 # collapse leading dims (layout no-op)
    fq_n = _l2norm_fast(fq_all).astype(mdt)                  # (Bt*Qp, F)
    scores_all = jnp.dot(fq_n, wbT_ref[...],
                         preferred_element_type=jnp.float32)  # (Bt*Qp, nKaP) f32

    # Hoisted constant (JAX does not CSE broadcast/iota inside the unrolled loop).
    col_iota = jax.lax.broadcasted_iota(jnp.int32, (nKaP, nKbP), 0)

    for bb in range(Bt):  # static unroll, capped at 4 by the wrapper
        # --- exact 0/1-matmul column select of the Kbase_ids base classes ------------------
        # padded id columns hold -1 -> all-zero select column -> score 0 (sliced off later)
        sel = (col_iota == ids_ref[bb]).astype(jnp.float32)                 # (nKaP, nKbP)
        sb = scores_all[bb * Qp:(bb + 1) * Qp]                              # (Qp, nKaP)
        scores_base = jnp.dot(sb, sel, preferred_element_type=jnp.float32)  # (Qp, nKbP)

        # --- FeatExemplarAvgBlock + L2 normalize --------------------------------------------
        fs_n = _l2norm_fast(fs_ref[bb])                                     # (T, F) f32
        wn = jnp.dot(labT_ref[bb].astype(mdt), fs_n.astype(mdt),
                     preferred_element_type=jnp.float32)                    # (nKnP, F)
        # The per-row 1/count scale cancels under L2 normalization and is dropped
        # (count==0 rows become 0 instead of NaN -- deliberate deviation from PyTorch).
        wn_n = _l2norm_fast(wn).astype(mdt)

        fqb_n = fq_n[bb * Qp:(bb + 1) * Qp]                                 # (Qp, F) mdt
        scores_novel = jnp.einsum("qf,kf->qk", fqb_n, wn_n,
                                  preferred_element_type=jnp.float32)       # (Qp, nKnP)

        # --- scale/bias (baddbmm beta=alpha=1), two lane-aligned unmasked stores -----------
        out_ref[bb, :, :nKbP] = scale * (bias + scores_base)
        out_ref[bb, :, nKbP:] = scale * (bias + scores_novel)


def _round_up(x, m):
    return ((x + m - 1) // m) * m


def _tpu_vmem_bytes():
    """Physical VMEM of this generation; conservative 64 MiB (v7x per-core) fallback."""
    try:
        info = pltpu.get_tpu_info()
        for name in ("vmem_capacity_bytes", "vmem_size_bytes", "vmem_bytes"):
            v = getattr(info, name, None)
            if v:
                return int(v)
    except Exception:
        pass
    return 64 << 20


def _pick_bt(batch, per_batch_bytes, resident_bytes, vmem_budget, max_unroll=4):
    """Largest batch block <= max_unroll that fits the VMEM budget and keeps pipeline depth."""
    candidates = []
    for bt in range(1, min(batch, max_unroll) + 1):
        if batch % bt:
            continue
        n_steps = batch // bt
        if n_steps < min(batch, 4):          # keep enough grid steps to pipeline / shard
            continue
        if 2 * bt * per_batch_bytes + resident_bytes > vmem_budget:
            continue
        candidates.append(bt)
    if not candidates:
        return 1
    even = [bt for bt in candidates if (batch // bt) % 2 == 0]   # v7x: even split across 2 TCs
    pool = even if even else candidates
    return max(pool)


def ktn_classifier(scale_cls, bias, weight_base, features_query, Kbase_ids,
                   features_support, labels_support, *,
                   matmul_dtype=jnp.bfloat16, block_b=None):
    B, Q, F = features_query.shape
    _, nKbase = Kbase_ids.shape
    _, T, _ = features_support.shape
    nKnovel = labels_support.shape[2]
    nKall = weight_base.shape[0]

    Qp = _round_up(Q, 16)            # bf16 packs 2 rows/sublane -> keep MXU operands packed-full
    nKbP = _round_up(nKbase, 128)    # lane-aligned base segment of the output slab
    nKnP = _round_up(nKnovel, 128)   # lane-aligned novel segment
    nKaP = _round_up(nKall, 128)     # lane-dense resident weight / base-score tile
    nKslab = nKbP + nKnP
    itemsize = jnp.dtype(matmul_dtype).itemsize

    # ---- VMEM budgeting (drives Bt and the scoped vmem limit) ------------------------------
    per_batch_bytes = (Qp * F * 4            # query feats block (f32)
                       + T * F * 4           # support feats block (f32)
                       + nKnP * T * 4        # labels^T block (f32)
                       + nKbP * 4            # ids block (i32)
                       + Qp * nKslab * 4)    # output block (f32)
    resident_bytes = F * nKaP * itemsize * 2   # resident weight, worst case double-buffered
    vmem_cap = _tpu_vmem_bytes()

    Bt = block_b if block_b is not None else _pick_bt(B, per_batch_bytes, resident_bytes,
                                                      vmem_cap // 4)
    assert B % Bt == 0, "batch must be divisible by the batch block"
    nB = B // Bt

    need = 2 * Bt * per_batch_bytes + resident_bytes
    vmem_limit = max(2 * need, 32 << 20)
    vmem_limit = min(vmem_limit, vmem_cap - (4 << 20))       # headroom under physical VMEM
    vmem_limit = int(max(vmem_limit, min(need + (2 << 20), vmem_cap - (4 << 20))))

    # ---- batch-independent prep (cheap XLA-side layout glue, done once) --------------------
    # base weights: L2-normalize (f32), transpose to (F, nKall), zero-pad lanes to 128
    wb_norm = jnp.sqrt(jnp.sum(weight_base * weight_base, axis=-1, keepdims=True))
    wb_n = weight_base / jnp.maximum(wb_norm, EPS)
    wbT = jnp.pad(wb_n.T, ((0, 0), (0, nKaP - nKall))).astype(matmul_dtype)      # (F, nKaP)

    fq = features_query
    if Qp != Q:
        fq = jnp.pad(fq, ((0, 0), (0, Qp - Q), (0, 0)))                          # (B, Qp, F)

    labT = jnp.swapaxes(labels_support, 1, 2)                                    # (B, Kn, T)
    if nKnP != nKnovel:
        labT = jnp.pad(labT, ((0, 0), (0, nKnP - nKnovel), (0, 0)))              # (B, nKnP, T)

    ids = Kbase_ids.astype(jnp.int32)
    ids3 = jnp.pad(ids, ((0, 0), (0, nKbP - nKbase)),
                   constant_values=-1).reshape(B, 1, nKbP)                       # (B, 1, nKbP)

    flops = int(2 * B * (Qp * nKaP * F + Qp * nKaP * nKbP + nKnP * T * F + Qp * nKnP * F))
    transcendentals = int(B * (Qp + T + nKnP))
    bytes_accessed = int(fq.nbytes + wbT.nbytes + features_support.nbytes
                         + labT.nbytes + ids3.nbytes + 8 + B * Qp * nKslab * 4)

    def _call(weight_spec):
        return pl.pallas_call(
            ktn_kernel,
            out_shape=jax.ShapeDtypeStruct((B, Qp, nKslab), jnp.float32),
            grid_spec=pltpu.PrefetchScalarGridSpec(
                num_scalar_prefetch=0,
                grid=(nB,),
                in_specs=[
                    pl.BlockSpec(memory_space=pltpu.MemorySpace.SMEM),       # scale_cls (1,)
                    pl.BlockSpec(memory_space=pltpu.MemorySpace.SMEM),       # bias      (1,)
                    pl.BlockSpec((Bt, 1, nKbP),  lambda g: (g, 0, 0)),       # Kbase ids (padded)
                    pl.BlockSpec((Bt, Qp, F),    lambda g: (g, 0, 0)),       # query feats (padded)
                    weight_spec,                                             # weight_base^T resident
                    pl.BlockSpec((Bt, T, F),     lambda g: (g, 0, 0)),       # support feats
                    pl.BlockSpec((Bt, nKnP, T),  lambda g: (g, 0, 0)),       # labels^T (padded)
                ],
                out_specs=pl.BlockSpec((Bt, Qp, nKslab), lambda g: (g, 0, 0)),
            ),
            compiler_params=pltpu.CompilerParams(
                dimension_semantics=("parallel",),
                vmem_limit_bytes=vmem_limit),
            cost_estimate=pl.CostEstimate(flops=flops, transcendentals=transcendentals,
                                          bytes_accessed=bytes_accessed),
        )(scale_cls, bias, ids3, fq, wbT, features_support, labT)

    # Prefer a single-buffered resident weight (constant index_map never changes, so one
    # buffer suffices); fall back to the default-buffered spec if this JAX build does not
    # support pipeline_mode on the main pallas_call path.
    try:
        out_pad = _call(pl.BlockSpec((F, nKaP), lambda g: (0, 0),
                                     pipeline_mode=pl.Buffered(1)))
    except Exception:
        out_pad = _call(pl.BlockSpec((F, nKaP), lambda g: (0, 0)))

    base = out_pad[:, :Q, :nKbase]
    novel = out_pad[:, :Q, nKbP:nKbP + nKnovel]
    return jnp.concatenate([base, novel], axis=-1)


def ktn_reference(scale_cls, bias, weight_base, features_query, Kbase_ids,
                  features_support, labels_support):
    """Pure-JAX reference mirroring the PyTorch forward (pred_fcw=None path)."""
    B, nKbase = Kbase_ids.shape
    F = weight_base.shape[1]
    wb = weight_base[Kbase_ids.reshape(-1)].reshape(B, nKbase, F)
    fs_n = _l2norm_ref(features_support)
    labT = jnp.swapaxes(labels_support, 1, 2)                      # (B, Kn, T)
    wn = jnp.einsum("bkt,btf->bkf", labT, fs_n)
    wn = wn / jnp.sum(labT, axis=2, keepdims=True)
    w = jnp.concatenate([wb, wn], axis=1)
    fq_n = _l2norm_ref(features_query)
    w_n = _l2norm_ref(w)
    scores = jnp.einsum("bqf,bkf->bqk", fq_n, w_n)
    return scale_cls[0] * (bias[0] + scores)


if __name__ == "__main__":
    key = jax.random.PRNGKey(0)
    k1, k2, k3, k4 = jax.random.split(key, 4)

    # Small shapes consistent with the module's forward semantics.
    B, nKall, nFeat = 2, 16, 128
    nKbase, nKnovel, shots = 8, 5, 2
    nTrain = nKnovel * shots
    nQuery = 6

    # Deterministic parameter init (matching __init__ distributions).
    weight_base = (jnp.sqrt(2.0 / nFeat)
                   * jax.random.normal(k1, (nKall, nFeat), dtype=jnp.float32))
    bias = jnp.zeros((1,), dtype=jnp.float32)
    scale_cls = jnp.full((1,), 10.0, dtype=jnp.float32)

    # Inputs.
    features_query = jax.random.normal(k2, (B, nQuery, nFeat), dtype=jnp.float32)
    features_support = jax.random.normal(k3, (B, nTrain, nFeat), dtype=jnp.float32)
    Kbase_ids = jax.random.randint(k4, (B, nKbase), 0, nKall, dtype=jnp.int32)
    support_classes = jnp.tile(jnp.arange(nKnovel, dtype=jnp.int32), shots)   # (nTrain,)
    labels_support = jnp.tile(
        jax.nn.one_hot(support_classes, nKnovel, dtype=jnp.float32)[None], (B, 1, 1))

    ref = ktn_reference(scale_cls, bias, weight_base, features_query, Kbase_ids,
                        features_support, labels_support)

    # f32 matmul-operand path (tight tolerance check).
    out_f32 = ktn_classifier(scale_cls, bias, weight_base, features_query, Kbase_ids,
                             features_support, labels_support, matmul_dtype=jnp.float32)
    out_f32 = jax.block_until_ready(out_f32)
    assert out_f32.shape == (B, nQuery, nKbase + nKnovel)
    assert jnp.allclose(out_f32, ref, atol=1e-3, rtol=1e-3), "f32 mismatch vs reference"

    # default bf16 matmul-operand path (MXU-native on v5e/v6e/v7x), f32 accumulation.
    out = ktn_classifier(scale_cls, bias, weight_base, features_query, Kbase_ids,
                         features_support, labels_support)
    out = jax.block_until_ready(out)
    assert out.shape == (B, nQuery, nKbase + nKnovel)
    assert jnp.allclose(out, ref, atol=0.15, rtol=0.05), "bf16 mismatch vs reference"

    print("KERNEL_OK")
</pallas_src>

<mosaic_0001>
module attributes {stable_mosaic.version = 11 : i64} {
  func.func @ktn_kernel(%arg0: i32, %arg1: memref<1xf32, #tpu.memory_space<smem>>, %arg2: memref<1xf32, #tpu.memory_space<smem>>, %arg3: memref<1x1x128xi32, #tpu.memory_space<vmem>>, %arg4: memref<1x16x128xf32, #tpu.memory_space<vmem>>, %arg5: memref<128x128xf32, #tpu.memory_space<vmem>>, %arg6: memref<1x10x128xf32, #tpu.memory_space<vmem>>, %arg7: memref<1x128x10xf32, #tpu.memory_space<vmem>>, %arg8: memref<1x16x256xf32, #tpu.memory_space<vmem>>) attributes {dimension_semantics = [#tpu.dimension_semantics<parallel>], iteration_bounds = array<i64: 2>, scalar_prefetch = 0 : i64, scratch_operands = 0 : i64, tpu.core_type = #tpu.core_type<tc>, window_params = [{transform_indices = @transform_0, window_bounds = array<i64: 1>}, {transform_indices = @transform_1, window_bounds = array<i64: 1>}, {transform_indices = @transform_2, window_bounds = array<i64: 1, 1, 128>}, {transform_indices = @transform_3, window_bounds = array<i64: 1, 16, 128>}, {pipeline_mode = #tpu.pipeline_mode<synchronous>, transform_indices = @transform_4, window_bounds = array<i64: 128, 128>}, {transform_indices = @transform_5, window_bounds = array<i64: 1, 10, 128>}, {transform_indices = @transform_6, window_bounds = array<i64: 1, 128, 10>}, {transform_indices = @transform_7, window_bounds = array<i64: 1, 16, 256>}]} {
    %c0 = arith.constant 0 : index
    %0 = memref.load %arg1[%c0] : memref<1xf32, #tpu.memory_space<smem>>
    %c0_0 = arith.constant 0 : index
    %1 = memref.load %arg2[%c0_0] : memref<1xf32, #tpu.memory_space<smem>>
    %c0_1 = arith.constant 0 : index
    %c0_2 = arith.constant 0 : index
    %c0_3 = arith.constant 0 : index
    %2 = vector.load %arg4[%c0_1, %c0_2, %c0_3] : memref<1x16x128xf32, #tpu.memory_space<vmem>>, vector<1x16x128xf32>
    %3 = vector.shape_cast %2 : vector<1x16x128xf32> to vector<16x128xf32>
    %4 = arith.mulf %3, %3 : vector<16x128xf32>
    %cst = arith.constant dense<0.000000e+00> : vector<16xf32>
    %5 = vector.multi_reduction <add>, %4, %cst [1] : vector<16x128xf32> to vector<16xf32>
    %6 = vector.shape_cast %5 : vector<16xf32> to vector<16x1xf32>
    %cst_4 = arith.constant 1.000000e-24 : f32
    %7 = vector.broadcast %cst_4 : f32 to vector<16x1xf32>
    %8 = arith.maximumf %6, %7 : vector<16x1xf32>
    %9 = math.rsqrt %8 : vector<16x1xf32>
    %10 = vector.broadcast %9 : vector<16x1xf32> to vector<16x128xf32>
    %11 = arith.mulf %3, %10 : vector<16x128xf32>
    %c0_5 = arith.constant 0 : index
    %c0_6 = arith.constant 0 : index
    %12 = vector.load %arg5[%c0_5, %c0_6] : memref<128x128xf32, #tpu.memory_space<vmem>>, vector<128x128xf32>
    %cst_7 = arith.constant dense<0.000000e+00> : vector<16x128xf32>
    %13 = tpu.matmul %11, %12, %cst_7 {dimension_numbers = #tpu.dot_dimension_numbers<[1], [0], [0], [1], [0, 0, 1, 1], [], []>} : vector<16x128xf32>, vector<128x128xf32>, vector<16x128xf32> -> vector<16x128xf32>
    %14 = tpu.iota {dimensions = array<i32: 0>} : vector<128x128xi32>
    %c0_8 = arith.constant 0 : index
    %c0_9 = arith.constant 0 : index
    %c0_10 = arith.constant 0 : index
    %15 = vector.load %arg3[%c0_8, %c0_9, %c0_10] : memref<1x1x128xi32, #tpu.memory_space<vmem>>, vector<1x1x128xi32>
    %16 = vector.shape_cast %15 : vector<1x1x128xi32> to vector<1x128xi32>
    %17 = vector.broadcast %16 : vector<1x128xi32> to vector<128x128xi32>
    %18 = arith.cmpi eq, %14, %17 : vector<128x128xi32>
    %19 = arith.extui %18 : vector<128x128xi1> to vector<128x128xi32>
    %20 = arith.sitofp %19 : vector<128x128xi32> to vector<128x128xf32>
    %cst_11 = arith.constant dense<0.000000e+00> : vector<16x128xf32>
    %21 = tpu.matmul %13, %20, %cst_11 {dimension_numbers = #tpu.dot_dimension_numbers<[1], [0], [0], [1], [0, 0, 1, 1], [], []>} : vector<16x128xf32>, vector<128x128xf32>, vector<16x128xf32> -> vector<16x128xf32>
    %c0_12 = arith.constant 0 : index
    %c0_13 = arith.constant 0 : index
    %c0_14 = arith.constant 0 : index
    %22 = vector.load %arg6[%c0_12, %c0_13, %c0_14] : memref<1x10x128xf32, #tpu.memory_space<vmem>>, vector<1x10x128xf32>
    %23 = vector.shape_cast %22 : vector<1x10x128xf32> to vector<10x128xf32>
    %24 = arith.mulf %23, %23 : vector<10x128xf32>
    %cst_15 = arith.constant dense<0.000000e+00> : vector<10xf32>
    %25 = vector.multi_reduction <add>, %24, %cst_15 [1] : vector<10x128xf32> to vector<10xf32>
    %26 = vector.shape_cast %25 : vector<10xf32> to vector<10x1xf32>
    %cst_16 = arith.constant 1.000000e-24 : f32
    %27 = vector.broadcast %cst_16 : f32 to vector<10x1xf32>
    %28 = arith.maximumf %26, %27 : vector<10x1xf32>
    %29 = math.rsqrt %28 : vector<10x1xf32>
    %30 = vector.broadcast %29 : vector<10x1xf32> to vector<10x128xf32>
    %31 = arith.mulf %23, %30 : vector<10x128xf32>
    %c0_17 = arith.constant 0 : index
    %c0_18 = arith.constant 0 : index
    %c0_19 = arith.constant 0 : index
    %32 = vector.load %arg7[%c0_17, %c0_18, %c0_19] : memref<1x128x10xf32, #tpu.memory_space<vmem>>, vector<1x128x10xf32>
    %33 = vector.shape_cast %32 : vector<1x128x10xf32> to vector<128x10xf32>
    %cst_20 = arith.constant dense<0.000000e+00> : vector<128x128xf32>
    %34 = tpu.matmul %33, %31, %cst_20 {dimension_numbers = #tpu.dot_dimension_numbers<[1], [0], [0], [1], [0, 0, 1, 1], [], []>} : vector<128x10xf32>, vector<10x128xf32>, vector<128x128xf32> -> vector<128x128xf32>
    %35 = arith.mulf %34, %34 : vector<128x128xf32>
    %cst_21 = arith.constant dense<0.000000e+00> : vector<128xf32>
    %36 = vector.multi_reduction <add>, %35, %cst_21 [1] : vector<128x128xf32> to vector<128xf32>
    %37 = vector.shape_cast %36 : vector<128xf32> to vector<128x1xf32>
    %cst_22 = arith.constant 1.000000e-24 : f32
    %38 = vector.broadcast %cst_22 : f32 to vector<128x1xf32>
    %39 = arith.maximumf %37, %38 : vector<128x1xf32>
    %40 = math.rsqrt %39 : vector<128x1xf32>
    %41 = vector.broadcast %40 : vector<128x1xf32> to vector<128x128xf32>
    %42 = arith.mulf %34, %41 : vector<128x128xf32>
    "tpu.trace_start"() <{level = 10 : i32, message = "qf,kf->qk"}> : () -> ()
    %cst_23 = arith.constant dense<0.000000e+00> : vector<16x128xf32>
    %43 = tpu.matmul %11, %42, %cst_23 {dimension_numbers = #tpu.dot_dimension_numbers<[1], [1], [0], [0], [0, 0, 1, 0], [], []>} : vector<16x128xf32>, vector<128x128xf32>, vector<16x128xf32> -> vector<16x128xf32>
    "tpu.trace_stop"() : () -> ()
    %44 = vector.broadcast %1 : f32 to vector<16x128xf32>
    %45 = arith.addf %44, %21 : vector<16x128xf32>
    %46 = vector.broadcast %0 : f32 to vector<16x128xf32>
    %47 = arith.mulf %46, %45 : vector<16x128xf32>
    %c0_24 = arith.constant 0 : index
    %c0_25 = arith.constant 0 : index
    %c0_26 = arith.constant 0 : index
    %48 = vector.load %arg8[%c0_24, %c0_25, %c0_26] : memref<1x16x256xf32, #tpu.memory_space<vmem>>, vector<1x16x128xf32>
    %49 = vector.shape_cast %48 : vector<1x16x128xf32> to vector<16x128xf32>
    %50 = vector.shape_cast %47 : vector<16x128xf32> to vector<1x16x128xf32>
    tpu.vector_store %arg8[%c0_24, %c0_25, %c0_26], %50 {strides = array<i32>} : memref<1x16x256xf32, #tpu.memory_space<vmem>>, vector<1x16x128xf32>,
    %51 = vector.broadcast %1 : f32 to vector<16x128xf32>
    %52 = arith.addf %51, %43 : vector<16x128xf32>
    %53 = vector.broadcast %0 : f32 to vector<16x128xf32>
    %54 = arith.mulf %53, %52 : vector<16x128xf32>
    %c0_27 = arith.constant 0 : index
    %c0_28 = arith.constant 0 : index
    %c128 = arith.constant 128 : index
    %55 = vector.load %arg8[%c0_27, %c0_28, %c128] : memref<1x16x256xf32, #tpu.memory_space<vmem>>, vector<1x16x128xf32>
    %56 = vector.shape_cast %55 : vector<1x16x128xf32> to vector<16x128xf32>
    %57 = vector.shape_cast %54 : vector<16x128xf32> to vector<1x16x128xf32>
    tpu.vector_store %arg8[%c0_27, %c0_28, %c128], %57 {strides = array<i32>} : memref<1x16x256xf32, #tpu.memory_space<vmem>>, vector<1x16x128xf32>,
    return
  }
  func.func @transform_0(%arg0: i32) -> i32 {
    %c0_i32 = arith.constant 0 : i32
    %c0_i32_0 = arith.constant 0 : i32
    return %c0_i32 : i32
  }
  func.func @transform_1(%arg0: i32) -> i32 {
    %c0_i32 = arith.constant 0 : i32
    %c0_i32_0 = arith.constant 0 : i32
    return %c0_i32 : i32
  }
  func.func @transform_2(%arg0: i32) -> (i32, i32, i32) {
    %c0_i32 = arith.constant 0 : i32
    %c0_i32_0 = arith.constant 0 : i32
    %c0_i32_1 = arith.constant 0 : i32
    return %arg0, %c0_i32, %c0_i32_0 : i32, i32, i32
  }
  func.func @transform_3(%arg0: i32) -> (i32, i32, i32) {
    %c0_i32 = arith.constant 0 : i32
    %c0_i32_0 = arith.constant 0 : i32
    %c0_i32_1 = arith.constant 0 : i32
    return %arg0, %c0_i32, %c0_i32_0 : i32, i32, i32
  }
  func.func @transform_4(%arg0: i32) -> (i32, i32) {
    %c0_i32 = arith.constant 0 : i32
    %c0_i32_0 = arith.constant 0 : i32
    %c0_i32_1 = arith.constant 0 : i32
    return %c0_i32, %c0_i32_0 : i32, i32
  }
  func.func @transform_5(%arg0: i32) -> (i32, i32, i32) {
    %c0_i32 = arith.constant 0 : i32
    %c0_i32_0 = arith.constant 0 : i32
    %c0_i32_1 = arith.constant 0 : i32
    return %arg0, %c0_i32, %c0_i32_0 : i32, i32, i32
  }
  func.func @transform_6(%arg0: i32) -> (i32, i32, i32) {
    %c0_i32 = arith.constant 0 : i32
    %c0_i32_0 = arith.constant 0 : i32
    %c0_i32_1 = arith.constant 0 : i32
    return %arg0, %c0_i32, %c0_i32_0 : i32, i32, i32
  }
  func.func @transform_7(%arg0: i32) -> (i32, i32, i32) {
    %c0_i32 = arith.constant 0 : i32
    %c0_i32_0 = arith.constant 0 : i32
    %c0_i32_1 = arith.constant 0 : i32
    return %arg0, %c0_i32, %c0_i32_0 : i32, i32, i32
  }
}

module attributes {stable_mosaic.version = 11 : i64} {
  func.func @ktn_kernel(%arg0: i32, %arg1: memref<1xf32, #tpu.memory_space<smem>>, %arg2: memref<1xf32, #tpu.memory_space<smem>>, %arg3: memref<1x1x128xi32, #tpu.memory_space<vmem>>, %arg4: memref<1x16x128xf32, #tpu.memory_space<vmem>>, %arg5: memref<128x128xf32, #tpu.memory_space<vmem>>, %arg6: memref<1x10x128xf32, #tpu.memory_space<vmem>>, %arg7: memref<1x128x10xf32, #tpu.memory_space<vmem>>, %arg8: memref<1x16x256xf32, #tpu.memory_space<vmem>>) attributes {dimension_semantics = [#tpu.dimension_semantics<parallel>], iteration_bounds = array<i64: 2>, scalar_prefetch = 0 : i64, scratch_operands = 0 : i64, tpu.core_type = #tpu.core_type<tc>, window_params = [{transform_indices = @transform_0, window_bounds = array<i64: 1>}, {transform_indices = @transform_1, window_bounds = array<i64: 1>}, {transform_indices = @transform_2, window_bounds = array<i64: 1, 1, 128>}, {transform_indices = @transform_3, window_bounds = array<i64: 1, 16, 128>}, {pipeline_mode = #tpu.pipeline_mode<synchronous>, transform_indices = @transform_4, window_bounds = array<i64: 128, 128>}, {transform_indices = @transform_5, window_bounds = array<i64: 1, 10, 128>}, {transform_indices = @transform_6, window_bounds = array<i64: 1, 128, 10>}, {transform_indices = @transform_7, window_bounds = array<i64: 1, 16, 256>}]} {
    %c0 = arith.constant 0 : index
    %0 = memref.load %arg1[%c0] : memref<1xf32, #tpu.memory_space<smem>>
    %c0_0 = arith.constant 0 : index
    %1 = memref.load %arg2[%c0_0] : memref<1xf32, #tpu.memory_space<smem>>
    %c0_1 = arith.constant 0 : index
    %c0_2 = arith.constant 0 : index
    %c0_3 = arith.constant 0 : index
    %2 = vector.load %arg4[%c0_1, %c0_2, %c0_3] : memref<1x16x128xf32, #tpu.memory_space<vmem>>, vector<1x16x128xf32>
    %3 = vector.shape_cast %2 : vector<1x16x128xf32> to vector<16x128xf32>
    %4 = arith.mulf %3, %3 : vector<16x128xf32>
    %cst = arith.constant dense<0.000000e+00> : vector<16xf32>
    %5 = vector.multi_reduction <add>, %4, %cst [1] : vector<16x128xf32> to vector<16xf32>
    %6 = vector.shape_cast %5 : vector<16xf32> to vector<16x1xf32>
    %cst_4 = arith.constant 1.000000e-24 : f32
    %7 = vector.broadcast %cst_4 : f32 to vector<16x1xf32>
    %8 = arith.maximumf %6, %7 : vector<16x1xf32>
    %9 = math.rsqrt %8 : vector<16x1xf32>
    %10 = vector.broadcast %9 : vector<16x1xf32> to vector<16x128xf32>
    %11 = arith.mulf %3, %10 : vector<16x128xf32>
    %c0_5 = arith.constant 0 : index
    %c0_6 = arith.constant 0 : index
    %12 = vector.load %arg5[%c0_5, %c0_6] : memref<128x128xf32, #tpu.memory_space<vmem>>, vector<128x128xf32>
    %cst_7 = arith.constant dense<0.000000e+00> : vector<16x128xf32>
    %13 = tpu.matmul %11, %12, %cst_7 {dimension_numbers = #tpu.dot_dimension_numbers<[1], [0], [0], [1], [0, 0, 1, 1], [], []>} : vector<16x128xf32>, vector<128x128xf32>, vector<16x128xf32> -> vector<16x128xf32>
    %14 = tpu.iota {dimensions = array<i32: 0>} : vector<128x128xi32>
    %c0_8 = arith.constant 0 : index
    %c0_9 = arith.constant 0 : index
    %c0_10 = arith.constant 0 : index
    %15 = vector.load %arg3[%c0_8, %c0_9, %c0_10] : memref<1x1x128xi32, #tpu.memory_space<vmem>>, vector<1x1x128xi32>
    %16 = vector.shape_cast %15 : vector<1x1x128xi32> to vector<1x128xi32>
    %17 = vector.broadcast %16 : vector<1x128xi32> to vector<128x128xi32>
    %18 = arith.cmpi eq, %14, %17 : vector<128x128xi32>
    %19 = arith.extui %18 : vector<128x128xi1> to vector<128x128xi32>
    %20 = arith.sitofp %19 : vector<128x128xi32> to vector<128x128xf32>
    %cst_11 = arith.constant dense<0.000000e+00> : vector<16x128xf32>
    %21 = tpu.matmul %13, %20, %cst_11 {dimension_numbers = #tpu.dot_dimension_numbers<[1], [0], [0], [1], [0, 0, 1, 1], [], []>} : vector<16x128xf32>, vector<128x128xf32>, vector<16x128xf32> -> vector<16x128xf32>
    %c0_12 = arith.constant 0 : index
    %c0_13 = arith.constant 0 : index
    %c0_14 = arith.constant 0 : index
    %22 = vector.load %arg6[%c0_12, %c0_13, %c0_14] : memref<1x10x128xf32, #tpu.memory_space<vmem>>, vector<1x10x128xf32>
    %23 = vector.shape_cast %22 : vector<1x10x128xf32> to vector<10x128xf32>
    %24 = arith.mulf %23, %23 : vector<10x128xf32>
    %cst_15 = arith.constant dense<0.000000e+00> : vector<10xf32>
    %25 = vector.multi_reduction <add>, %24, %cst_15 [1] : vector<10x128xf32> to vector<10xf32>
    %26 = vector.shape_cast %25 : vector<10xf32> to vector<10x1xf32>
    %cst_16 = arith.constant 1.000000e-24 : f32
    %27 = vector.broadcast %cst_16 : f32 to vector<10x1xf32>
    %28 = arith.maximumf %26, %27 : vector<10x1xf32>
    %29 = math.rsqrt %28 : vector<10x1xf32>
    %30 = vector.broadcast %29 : vector<10x1xf32> to vector<10x128xf32>
    %31 = arith.mulf %23, %30 : vector<10x128xf32>
    %c0_17 = arith.constant 0 : index
    %c0_18 = arith.constant 0 : index
    %c0_19 = arith.constant 0 : index
    %32 = vector.load %arg7[%c0_17, %c0_18, %c0_19] : memref<1x128x10xf32, #tpu.memory_space<vmem>>, vector<1x128x10xf32>
    %33 = vector.shape_cast %32 : vector<1x128x10xf32> to vector<128x10xf32>
    %cst_20 = arith.constant dense<0.000000e+00> : vector<128x128xf32>
    %34 = tpu.matmul %33, %31, %cst_20 {dimension_numbers = #tpu.dot_dimension_numbers<[1], [0], [0], [1], [0, 0, 1, 1], [], []>} : vector<128x10xf32>, vector<10x128xf32>, vector<128x128xf32> -> vector<128x128xf32>
    %35 = arith.mulf %34, %34 : vector<128x128xf32>
    %cst_21 = arith.constant dense<0.000000e+00> : vector<128xf32>
    %36 = vector.multi_reduction <add>, %35, %cst_21 [1] : vector<128x128xf32> to vector<128xf32>
    %37 = vector.shape_cast %36 : vector<128xf32> to vector<128x1xf32>
    %cst_22 = arith.constant 1.000000e-24 : f32
    %38 = vector.broadcast %cst_22 : f32 to vector<128x1xf32>
    %39 = arith.maximumf %37, %38 : vector<128x1xf32>
    %40 = math.rsqrt %39 : vector<128x1xf32>
    %41 = vector.broadcast %40 : vector<128x1xf32> to vector<128x128xf32>
    %42 = arith.mulf %34, %41 : vector<128x128xf32>
    "tpu.trace_start"() <{level = 10 : i32, message = "qf,kf->qk"}> : () -> ()
    %cst_23 = arith.constant dense<0.000000e+00> : vector<16x128xf32>
    %43 = tpu.matmul %11, %42, %cst_23 {dimension_numbers = #tpu.dot_dimension_numbers<[1], [1], [0], [0], [0, 0, 1, 0], [], []>} : vector<16x128xf32>, vector<128x128xf32>, vector<16x128xf32> -> vector<16x128xf32>
    "tpu.trace_stop"() : () -> ()
    %44 = vector.broadcast %1 : f32 to vector<16x128xf32>
    %45 = arith.addf %44, %21 : vector<16x128xf32>
    %46 = vector.broadcast %0 : f32 to vector<16x128xf32>
    %47 = arith.mulf %46, %45 : vector<16x128xf32>
    %c0_24 = arith.constant 0 : index
    %c0_25 = arith.constant 0 : index
    %c0_26 = arith.constant 0 : index
    %48 = vector.load %arg8[%c0_24, %c0_25, %c0_26] : memref<1x16x256xf32, #tpu.memory_space<vmem>>, vector<1x16x128xf32>
    %49 = vector.shape_cast %48 : vector<1x16x128xf32> to vector<16x128xf32>
    %50 = vector.shape_cast %47 : vector<16x128xf32> to vector<1x16x128xf32>
    tpu.vector_store %arg8[%c0_24, %c0_25, %c0_26], %50 {strides = array<i32>} : memref<1x16x256xf32, #tpu.memory_space<vmem>>, vector<1x16x128xf32>,
    %51 = vector.broadcast %1 : f32 to vector<16x128xf32>
    %52 = arith.addf %51, %43 : vector<16x128xf32>
    %53 = vector.broadcast %0 : f32 to vector<16x128xf32>
    %54 = arith.mulf %53, %52 : vector<16x128xf32>
    %c0_27 = arith.constant 0 : index
    %c0_28 = arith.constant 0 : index
    %c128 = arith.constant 128 : index
    %55 = vector.load %arg8[%c0_27, %c0_28, %c128] : memref<1x16x256xf32, #tpu.memory_space<vmem>>, vector<1x16x128xf32>
    %56 = vector.shape_cast %55 : vector<1x16x128xf32> to vector<16x128xf32>
    %57 = vector.shape_cast %54 : vector<16x128xf32> to vector<1x16x128xf32>
    tpu.vector_store %arg8[%c0_27, %c0_28, %c128], %57 {strides = array<i32>} : memref<1x16x256xf32, #tpu.memory_space<vmem>>, vector<1x16x128xf32>,
    return
  }
  func.func @transform_0(%arg0: i32) -> i32 {
    %c0_i32 = arith.constant 0 : i32
    %c0_i32_0 = arith.constant 0 : i32
    return %c0_i32 : i32
  }
  func.func @transform_1(%arg0: i32) -> i32 {
    %c0_i32 = arith.constant 0 : i32
    %c0_i32_0 = arith.constant 0 : i32
    return %c0_i32 : i32
  }
  func.func @transform_2(%arg0: i32) -> (i32, i32, i32) {
    %c0_i32 = arith.constant 0 : i32
    %c0_i32_0 = arith.constant 0 : i32
    %c0_i32_1 = arith.constant 0 : i32
    return %arg0, %c0_i32, %c0_i32_0 : i32, i32, i32
  }
  func.func @transform_3(%arg0: i32) -> (i32, i32, i32) {
    %c0_i32 = arith.constant 0 : i32
    %c0_i32_0 = arith.constant 0 : i32
    %c0_i32_1 = arith.constant 0 : i32
    return %arg0, %c0_i32, %c0_i32_0 : i32, i32, i32
  }
  func.func @transform_4(%arg0: i32) -> (i32, i32) {
    %c0_i32 = arith.constant 0 : i32
    %c0_i32_0 = arith.constant 0 : i32
    %c0_i32_1 = arith.constant 0 : i32
    return %c0_i32, %c0_i32_0 : i32, i32
  }
  func.func @transform_5(%arg0: i32) -> (i32, i32, i32) {
    %c0_i32 = arith.constant 0 : i32
    %c0_i32_0 = arith.constant 0 : i32
    %c0_i32_1 = arith.constant 0 : i32
    return %arg0, %c0_i32, %c0_i32_0 : i32, i32, i32
  }
  func.func @transform_6(%arg0: i32) -> (i32, i32, i32) {
    %c0_i32 = arith.constant 0 : i32
    %c0_i32_0 = arith.constant 0 : i32
    %c0_i32_1 = arith.constant 0 : i32
    return %arg0, %c0_i32, %c0_i32_0 : i32, i32, i32
  }
  func.func @transform_7(%arg0: i32) -> (i32, i32, i32) {
    %c0_i32 = arith.constant 0 : i32
    %c0_i32_0 = arith.constant 0 : i32
    %c0_i32_1 = arith.constant 0 : i32
    return %arg0, %c0_i32, %c0_i32_0 : i32, i32, i32
  }
}

</mosaic_0001>

<bundles_post_ra>
// kernel: tpu_custom_call.1
= control target key start
LH: loop header
LB: loop body
LE: loop exit
PB: predicated region body
PF: predicated region fallthrough
CT: control target
= control target key end

     0   :  { %s1899_s0 = inlined_call_operand.<no memory space> [shape: f32[1], index: 0, kind: input, shape index: {}]   ;;  %s1900_s1 = inlined_call_operand.<no memory space> [shape: f32[1], index: 1, kind: input, shape index: {}]   ;;  %s1901_s2 = inlined_call_operand.vmem [shape: s32[2,1,128], index: 2, kind: input, shape index: {}]   ;;  %s1902_s3 = inlined_call_operand.vmem [shape: f32[2,16,128], index: 3, kind: input, shape index: {}]   ;;  %s1903_s4 = inlined_call_operand.vmem [shape: f32[128,128], index: 4, kind: input, shape index: {}]   ;;  %s1904_s5 = inlined_call_operand.vmem [shape: f32[2,10,128], index: 5, kind: input, shape index: {}]   ;;  %s1905_s6 = inlined_call_operand.vmem [shape: f32[2,128,10], index: 6, kind: input, shape index: {}]   ;;  %s1906_s7 = inlined_call_operand.hbm [shape: f32[2,16,256], index: 7, kind: output, shape index: {}]  }
   0x1   :  { %12 = sst [smem:[#allocation2]] %s1899_s0 }
   0x2   :  { %13 = sst [smem:[#allocation3]] %s1900_s1 }
   0x3   :  { %14 = vsyncpa [#allocation5], 0 }
   0x4   :  { %16 = vsyncpa [#allocation5 + $0x1], 0  ;;  %s1318_s28 = smov 0   ;;  %s1320_s29 = smov 0  }
   0x5   :  { %s1322_s30 = smov 0   ;;  %s1324_s8 = smov 0  }
   0x6 LB: > { %s1339_s0 = sadd.s32 4294967295, %s1267_s8   ;;  %s1051_s1 = sadd.s32 4294967294, %s1267_s8   ;;  %s1267_s8 = sphi %s1324_s8, %s1926_s8   ;;  %s1263_s30 = sphi %s1322_s30, %s1925_s30   ;;  %s1259_s29 = sphi %s1320_s29, %s1924_s29   ;;  %s1255_s28 = sphi %s1318_s28, %s1923_s28  }
   0x7   : > { %s1343_s9 = sadd.s32 1, %s1267_s8   ;;  %s196_s10 = sadd.s32 1, %s1263_s30 }
   0x8   : > { %s193_s11 = ssub.s32 %s1267_s8, %s1343_s9  ;;  %p206_p0 = scmp.ne.s32.totalorder %s1263_s30, %s1259_s29 }
   0x9   : > { %p194_p1 = scmp.eq.s32.totalorder %s193_s11, 0  ;;  %p207_p2 = scmp.eq.s32.totalorder %s1339_s0, 1 }
   0xa   : > { %p212_p3 = scmp.ne.s32.totalorder %s1259_s29, %s1255_s28  ;;  %p213_p4 = scmp.eq.s32.totalorder %s1051_s1, 1 }
   0xb   : > { %s1354_s12 = scalar_select %p194_p1, %s1263_s30, %s196_s10  }
   0xc   : > { %p1356_p5 = por %p207_p2, %p206_p0  ;;  %p1360_p6 = por %p213_p4, %p212_p3 }
   0xd   : > { %p1054_p7 = scmp.ge.s32.totalorder %s1267_s8, 1  ;;  %p270_p8 = scmp.lt.s32.totalorder %s1267_s8, 3 }
   0xf   : > { %p271_p9 = pnand %p1054_p7, %p270_p8 }
  0x10   : > { %p315_p10 = scmp.lt.s32.totalorder (!%p271_p9), %s1339_s0, 1  ;;  %s312_s21 = sand.u32 (!%p271_p9), 1, %s1259_s29  }
  0x11   : > { %274 = sbr.rel (%p271_p9) target bundleno = 728 (0x2d8), region = 48  ;;  %s1119_s25 = sshll.u32 (!%p271_p9), %s1339_s0, 5 }
  0x12   : > { %s952_s1 = scalar_lea.hbm (!%p271_p9), %s1906_s7, %s1119_s25  ;;  %s1225_s20 = scalar_lea.hbm (!%p271_p9), %s1906_s7, 64 }
  0x13   : > { %s955_s11 = sshll.u32 (!%p271_p9), %s952_s1, 4  ;;  %s956_s11 = int_to_ptr.hbm [resolvable:$true] %s955_s11 }
  0x14   : > { %s1219_s17 = sshra.s32 (!%p271_p9), %s956_s11, 4  ;;  %s1220_s17 = int_to_ptr.hbm [resolvable:$true] %s1219_s17 }
  0x15   : > { %s1221_s18 = scalar_lea.hbm (!%p271_p9), %s1220_s17, 32  ;;  %p1226_p0 = scmp.lt.s32.totalorder (!%p271_p9), %s1220_s17, %s1906_s7 }
  0x16   : > { %s1368_s15 = scalar_select %p315_p10, %s1339_s0, 1  ;;  %vm502_vm0 = vcmask 1041408   ;;  %vm546_vm7 = vcmask 80896  }
  0x17   : > { %p1222_p11 = scmp.ne.s32.totalorder %s1220_s17, %s1221_s18  ;;  %p1227_p1 = scmp.lt.s32.totalorder %s1225_s20, %s1221_s18 }
  0x18   : > { %s1116_s16 = sshll.u32 %s1368_s15, 4  ;;  %s317_s22 = scalar_lea.vmem %s1901_s2, %s1368_s15 }
  0x19   : > { %s327_s19 = scalar_lea.vmem %s1904_s5, %s1116_s16  ;;  %s1118_s23 = sshll.u32 %s1368_s15, 7 }
  0x1a   : > { %v497_v0 = vld [vmem:[%s327_s19 + $0x8] sm:$0x3]  ;;  %v496_v3 = vld [vmem:[%s327_s19] sm:$0xff]  ;;  %s1387_s26 = scalar_lea.vmem %s1905_s6, %s1118_s23  ;;  %s322_s10 = scalar_lea.vmem %s1902_s3, %s1116_s16 }
  0x1b   : > { %v499_v1 = vmul.f32 %v497_v0, %v497_v0  ;;  %v498_v4 = vmul.f32 %v496_v3, %v496_v3  ;;  %v537_v25 = vld [vmem:[%s1387_s26 + $0x38] sm:$0xff]  ;;  %v530_v26 = vld [vmem:[%s1387_s26] sm:$0xff]  ;;  %v531_v28 = vld [vmem:[%s1387_s26 + $0x8] sm:$0xff]  ;;  %s334_s15 = sld [smem:[#allocation3]]  ;;  %s1055_s23 = sshll.u32 %s312_s21, 5 }
  0x1c   : > { %v538_v27 = vld [vmem:[%s1387_s26 + $0x40] sm:$0xff]  ;;  %v539_v29 = vld [vmem:[%s1387_s26 + $0x48] sm:$0xff]  ;;  %v532_v30 = vld [vmem:[%s1387_s26 + $0x10] sm:$0xff]  ;;  %s314_s24 = scalar_lea.vmem [#allocation4], %s1055_s23  ;;  %s941_s16 = scalar_lea.sflag [#allocation5], %s312_s21 }
  0x1d   : > { %v503_v2 = vsel %vm502_vm0, %v499_v1, 0.0  ;;  %v540_v31 = vld [vmem:[%s1387_s26 + $0x50] sm:$0xff]  ;;  %v533_v32 = vld [vmem:[%s1387_s26 + $0x18] sm:$0xff]  ;;  %v534_v34 = vld [vmem:[%s1387_s26 + $0x20] sm:$0xff]  ;;  %p1223_p12 = pnand %p1222_p11, %p1356_p5  ;;  %p1228_p2 = por %p1227_p1, %p1226_p0 }
  0x1e   : > { %504 = vadd.xlane.f32.xlu0 %v503_v2  ;;  %v541_v33 = vld [vmem:[%s1387_s26 + $0x58] sm:$0xff]  ;;  %v1414_v35 = vld [vmem:[%s322_s10] sm:$0xff]  ;;  %v535_v38 = vld [vmem:[%s1387_s26 + $0x28] sm:$0xff] }
  0x1f   : > { %v337_v36 = vmul.f32 %v1414_v35, %v1414_v35  ;;  %v542_v37 = vld [vmem:[%s1387_s26 + $0x60] sm:$0xff]  ;;  %v543_v39 = vld [vmem:[%s1387_s26 + $0x68] sm:$0xff]  ;;  %v536_v40 = vld [vmem:[%s1387_s26 + $0x30] sm:$0xff]  ;;  %p1224_p13 = pneg %p1223_p12 }
  0x20   : > { %v544_v41 = vld [vmem:[%s1387_s26 + $0x70] sm:$0xff]  ;;  %v545_v42 = vld [vmem:[%s1387_s26 + $0x78] sm:$0xff]  ;;  %v1430_v43 = vld [vmem:[%s322_s10 + $0x8] sm:$0xff]  ;;  %s953_s10 = sshll.u32 %s314_s24, 4  ;;  %s954_s10 = int_to_ptr.vmem [resolvable:$true] %s953_s10 }
  0x21   : > { %339 = vadd.xlane.f32.xlu1 %v337_v36  ;;  %v338_v44 = vmul.f32 %v1430_v43, %v1430_v43  ;;  %v370_v36 = vld [vmem:[%s1903_s4 + $0x18] sm:$0xff]  ;;  %p1229_p3 = pnand %p1228_p2, %p1224_p13 }
  0x26   : > { %500 = vadd.xlane.f32.xlu0 %v498_v4 }
  0x29   : > { %341 = vadd.xlane.f32.xlu1 %v338_v44  ;;  %v367_v44 = vld [vmem:[%s1903_s4] sm:$0xff] }
  0x91   : > { %v505_v5 = vpop.xlane.xlu0 %504 }
  0x92   : > { %v507_v6 = vmax.f32 %v505_v5, 1e-24  ;;  %v382_v5 = vld [vmem:[%s1903_s4 + $0x78] sm:$0xff] }
  0x93   : > { %383 = vmatpush.msra.mxu1 %v382_v5 }
  0x94   : > { %1165 = vrsqrt.f32 %v507_v6  ;;  %vm524_vm2 = vweird.f32 %v507_v6 }
  0x99   : > { %v501_v7 = vpop.xlane.xlu0 %500 }
  0x9a   : > { %v1166_v8 = vpop.eup %1165  ;;  %v506_v9 = vmax.f32 %v501_v7, 1e-24 }
  0x9b   : > { %v519_v10 = vmul.f32 %v1166_v8, %v507_v6  ;;  %vm525_vm1 = vweird.f32 %v1166_v8 }
  0x9c   : > { %1167 = vrsqrt.f32 %v506_v9  ;;  %vm526_vm3 = vmor %vm524_vm2, %vm525_vm1  ;;  %vm514_vm5 = vweird.f32 %v506_v9 }
  0x9d   : > { %v520_v11 = vmul.f32 %v1166_v8, %v519_v10  ;;  %v380_v10 = vld [vmem:[%s1903_s4 + $0x68] sm:$0xff] }
  0x9f   : > { %v521_v12 = vmul.f32 0.5, %v520_v11  ;;  %v340_v11 = vpop.xlane.xlu1 %339 }
  0xa1   : > { %v522_v13 = vsub.f32 1.5, %v521_v12  ;;  %v343_v12 = vmax.f32 %v340_v11, 1e-24 }
  0xa2   : > { %v1168_v14 = vpop.eup %1167 }
  0xa3   : > { %v509_v15 = vmul.f32 %v1168_v14, %v506_v9  ;;  %v523_v16 = vmul.f32 %v1166_v8, %v522_v13  ;;  %vm515_vm4 = vweird.f32 %v1168_v14  ;;  %v381_v9 = vld [vmem:[%s1903_s4 + $0x70] sm:$0xff]  ;;  %v379_v13 = vld [vmem:[%s1903_s4 + $0x60] sm:$0xff]  ;;  %1169 = vrsqrt.f32 %v343_v12 }
  0xa4   : > { %vm516_vm6 = vmor %vm514_vm5, %vm515_vm4  ;;  %384 = vmatpush.msra.mxu1 %v381_v9  ;;  %vm351_vm8 = vweird.f32 %v343_v12 }
  0xa5   : > { %v510_v17 = vmul.f32 %v1168_v14, %v509_v15  ;;  %v527_v18 = vsel %vm526_vm3, %v1166_v8, %v523_v16 }
  0xa6   : > { %v529_v19 = vmul.f32 %v527_v18, %v497_v0  ;;  %385 = vmatpush.msra.mxu1 %v380_v10  ;;  %v376_v18 = vld [vmem:[%s1903_s4 + $0x48] sm:$0xff] }
  0xa7   : > { %v511_v20 = vmul.f32 0.5, %v510_v17  ;;  %v377_v17 = vld [vmem:[%s1903_s4 + $0x50] sm:$0xff] }
  0xa8   : > { %1094 = vmatpush.msk.msra.mxu0 %vm502_vm0, %v529_v19  ;;  %1120 = vmatpush.msk.msra.mxu2 %vm502_vm0, %v529_v19 }
  0xa9   : > { %v512_v21 = vsub.f32 1.5, %v511_v20  ;;  %386 = vmatpush.msra.mxu1 %v379_v13  ;;  %v1170_v19 = vpop.eup %1169 }
  0xaa   : > { %v346_v20 = vmul.f32 %v1170_v19, %v343_v12  ;;  %vm352_vm9 = vweird.f32 %v1170_v19 }
  0xab   : > { %v513_v22 = vmul.f32 %v1168_v14, %v512_v21  ;;  %v375_v21 = vld [vmem:[%s1903_s4 + $0x40] sm:$0xff]  ;;  %vm353_vm10 = vmor %vm351_vm8, %vm352_vm9 }
  0xad   : > { %v517_v23 = vsel %vm516_vm6, %v1168_v14, %v513_v22  ;;  %v378_v14 = vld [vmem:[%s1903_s4 + $0x58] sm:$0xff]  ;;  %v342_v22 = vpop.xlane.xlu1 %341 }
  0xae   : > { %v528_v24 = vmul.f32 %v517_v23, %v496_v3  ;;  %387 = vmatpush.msra.mxu1 %v378_v14  ;;  %v347_v23 = vmul.f32 %v1170_v19, %v346_v20 }
  0xb0   : > { %613 = vmatpush.msra.mxu0 %v528_v24  ;;  %1121 = vmatpush.msra.mxu2 %v528_v24  ;;  %v374_v24 = vld [vmem:[%s1903_s4 + $0x38] sm:$0xff] }
  0xb1   : > { %1102 = vmatmul.msk.f32.vlgmr.msra.gmra.mxu2 %vm546_vm7, %v537_v25  ;;  %1095 = vmatmul.msk.f32.vlgmr.msra.gmra.mxu0 %vm546_vm7, %v530_v26  ;;  %v344_v25 = vmax.f32 %v342_v22, 1e-24 }
  0xb2   : > { %388 = vmatpush.msra.mxu1 %v377_v17 }
  0xb3   : > { %1171 = vrsqrt.f32 %v344_v25  ;;  %vm361_vm11 = vweird.f32 %v344_v25 }
  0xb4   : > { %389 = vmatpush.msra.mxu1 %v376_v18 }
  0xb6   : > { %390 = vmatpush.msra.mxu1 %v375_v21 }
  0xb8   : > { %391 = vmatpush.msra.mxu1 %v374_v24  ;;  %v406_v24 = vlaneseq }
  0xb9   : > { %1103 = vmatmul.msk.f32.gmra.mxu2 %vm546_vm7, %v538_v27  ;;  %1096 = vmatmul.msk.f32.gmra.mxu0 %vm546_vm7, %v531_v28  ;;  %v348_v27 = vmul.f32 0.5, %v347_v23  ;;  %v373_v28 = vld [vmem:[%s1903_s4 + $0x30] sm:$0xff] }
  0xba   : > { %392 = vmatpush.msra.mxu1 %v373_v28  ;;  %v1586_v28 = vld [vmem:[%s317_s22] ss:$0 sm:$0xff]  ;;  %s333_s22 = sld [smem:[#allocation2]] }
  0xc1   : > { %1104 = vmatmul.msk.f32.gmra.mxu2 %vm546_vm7, %v539_v29  ;;  %1097 = vmatmul.msk.f32.gmra.mxu0 %vm546_vm7, %v532_v30  ;;  %v349_v29 = vsub.f32 1.5, %v348_v27  ;;  %v372_v30 = vld [vmem:[%s1903_s4 + $0x28] sm:$0xff] }
  0xc2   : > { %393 = vmatpush.msra.mxu1 %v372_v30  ;;  %v1588_v30 = vshrl.u32 %v406_v24, 7 }
  0xc9   : > { %1105 = vmatmul.msk.f32.gmra.mxu2 %vm546_vm7, %v540_v31  ;;  %1098 = vmatmul.msk.f32.gmra.mxu0 %vm546_vm7, %v533_v32  ;;  %v371_v31 = vld [vmem:[%s1903_s4 + $0x20] sm:$0xff]  ;;  %v350_v32 = vmul.f32 %v1170_v19, %v349_v29 }
  0xca   : > { %394 = vmatpush.msra.mxu1 %v371_v31 }
  0xcc   : > { %395 = vmatpush.msra.mxu1 %v370_v36 }
  0xd1   : > { %1106 = vmatmul.msk.f32.gmra.mxu2 %vm546_vm7, %v541_v33  ;;  %1099 = vmatmul.msk.f32.gmra.mxu0 %vm546_vm7, %v534_v34  ;;  %v1172_v33 = vpop.eup %1171 }
  0xd2   : > { %vm362_vm12 = vweird.f32 %v1172_v33 }
  0xd3   : > { %vm363_vm13 = vmor %vm361_vm11, %vm362_vm12 }
  0xd9   : > { %1107 = vmatmul.msk.f32.gmra.mxu2 %vm546_vm7, %v542_v37  ;;  %1100 = vmatmul.msk.f32.gmra.mxu0 %vm546_vm7, %v535_v38  ;;  %v356_v37 = vmul.f32 %v1172_v33, %v344_v25  ;;  %v369_v38 = vld [vmem:[%s1903_s4 + $0x10] sm:$0xff] }
  0xda   : > { %396 = vmatpush.msra.mxu1 %v369_v38 }
  0xe1   : > { %1108 = vmatmul.msk.f32.gmra.mxu2 %vm546_vm7, %v543_v39  ;;  %1101 = vmatmul.msk.f32.gmra.mxu0 %vm546_vm7, %v536_v40  ;;  %v357_v39 = vmul.f32 %v1172_v33, %v356_v37  ;;  %v354_v40 = vsel %vm353_vm10, %v1170_v19, %v350_v32 }
  0xe9   : > { %1109 = vmatmul.msk.f32.gmra.mxu2 %vm546_vm7, %v544_v41  ;;  %v368_v41 = vld [vmem:[%s1903_s4 + $0x8] sm:$0xff] }
  0xea   : > { %397 = vmatpush.msra.mxu1 %v368_v41 }
  0xec   : > { %398 = vmatpush.msra.mxu1 %v367_v44 }
  0xf1   : > { %1110 = vmatmul.msk.f32.gmra.mxu2 %vm546_vm7, %v545_v42  ;;  %v358_v42 = vmul.f32 0.5, %v357_v39 }
 0x12e   : > { %v1434_v45 = vpop.f32.mrf.mxu0 }
 0x12f   : > { %v663_v8 = vmul.f32 %v1434_v45, %v1434_v45 }
 0x134   : > { %v1436_v46 = vpop.f32.mrf.mxu2 }
 0x135   : > { %v670_v3 = vmul.f32 %v1436_v46, %v1436_v46 }
 0x136   : > { %v1438_v47 = vpop.f32.mrf.mxu0 }
 0x137   : > { %v664_v16 = vmul.f32 %v1438_v47, %v1438_v47 }
 0x13c   : > { %v1440_v48 = vpop.f32.mrf.mxu2 }
 0x13d   : > { %v671_v26 = vmul.f32 %v1440_v48, %v1440_v48 }
 0x13e   : > { %v1442_v49 = vpop.f32.mrf.mxu0 }
 0x144   : > { %v1444_v50 = vpop.f32.mrf.mxu2 }
 0x145   : > { %v672_v60 = vmul.f32 %v1444_v50, %v1444_v50 }
 0x146   : > { %v1446_v51 = vpop.f32.mrf.mxu0 }
 0x147   : > { %v666_v2 = vmul.f32 %v1446_v51, %v1446_v51 }
 0x14c   : > { %v1448_v52 = vpop.f32.mrf.mxu2 }
 0x14d   : > { %v673_v0 = vmul.f32 %v1448_v52, %v1448_v52 }
 0x14e   : > { %v1452_v54 = vpop.f32.mrf.mxu0 }
 0x14f   : > { %v667_v6 = vmul.f32 %v1452_v54, %v1452_v54 }
 0x154   : > { %v1450_v53 = vpop.f32.mrf.mxu2 }
 0x155   : > { %v674_v15 = vmul.f32 %v1450_v53, %v1450_v53 }
 0x156   : > { %v1458_v57 = vpop.f32.mrf.mxu0 }
 0x157   : > { %v668_v34 = vmul.f32 %v1458_v57, %v1458_v57 }
 0x15c   : > { %v1454_v55 = vpop.f32.mrf.mxu2 }
 0x15d   : > { %v675_v56 = vmul.f32 %v1454_v55, %v1454_v55 }
 0x15e   : > { %v1466_v61 = vpop.f32.mrf.mxu0 }
 0x15f   : > { %703 = vadd.xlane.f32.xlu1 %v675_v56  ;;  %v669_v62 = vmul.f32 %v1466_v61, %v1466_v61  ;;  %v1545_v56 = vmul.f32 %v354_v40, %v1414_v35  ;;  %v422_v40 = vadd.s32 120, %v1588_v30 }
 0x161   : > { %399 = vmatmul.f32.vlgmr.msra.gmra.mxu1 %v1545_v56  ;;  %vm440_vm3 = vcmp.eq.s32.totalorder %v422_v40, %v1586_v28 }
 0x164   : > { %v1460_v58 = vpop.f32.mrf.mxu2 }
 0x165   : > { %v676_v59 = vmul.f32 %v1460_v58, %v1460_v58 }
 0x167   : > { %705 = vadd.xlane.f32.xlu0 %v676_v59  ;;  %697 = vadd.xlane.f32.xlu1 %v672_v60  ;;  %v359_v59 = vsub.f32 1.5, %v358_v42 }
 0x169   : > { %v360_v60 = vmul.f32 %v1172_v33, %v359_v59 }
 0x16c   : > { %v1470_v63 = vpop.f32.mrf.mxu2 }
 0x16d   : > { %v677_v7 = vmul.f32 %v1470_v63, %v1470_v63 }
 0x16f   : > { %699 = vadd.xlane.f32.xlu0 %v673_v0  ;;  %691 = vadd.xlane.f32.xlu1 %v669_v62  ;;  %v665_v62 = vmul.f32 %v1442_v49, %v1442_v49  ;;  %v364_v0 = vsel %vm363_vm13, %v1172_v33, %v360_v60 }
 0x174   : > { %v1474_v1 = vpop.f32.mrf.mxu2 }
 0x175   : > { %v678_v4 = vmul.f32 %v1474_v1, %v1474_v1 }
 0x177   : > { %693 = vadd.xlane.f32.xlu0 %v670_v3  ;;  %709 = vadd.xlane.f32.xlu2 %v678_v4 }
 0x178   : > { %685 = vadd.xlane.f32.xlu1 %v666_v2  ;;  %v1551_v2 = vmul.f32 %v364_v0, %v1430_v43  ;;  %v421_v0 = vadd.s32 112, %v1588_v30 }
 0x17a   : > { %402 = vmatmul.f32.gmra.mxu1 %v1551_v2  ;;  %vm439_vm4 = vcmp.eq.s32.totalorder %v421_v0, %v1586_v28 }
 0x17f   : > { %707 = vadd.xlane.f32.xlu2 %v677_v7  ;;  %687 = vadd.xlane.f32.xlu0 %v667_v6 }
 0x180   : > { %679 = vadd.xlane.f32.xlu1 %v663_v8 }
 0x187   : > { %701 = vadd.xlane.f32.xlu2 %v674_v15  ;;  %681 = vadd.xlane.f32.xlu0 %v664_v16 }
 0x18f   : > { %695 = vadd.xlane.f32.xlu2 %v671_v26 }
 0x197   : > { %689 = vadd.xlane.f32.xlu2 %v668_v34 }
 0x19f   : > { %683 = vadd.xlane.f32.xlu2 %v665_v62 }
 0x1d2   : > { %v704_v3 = vpop.xlane.xlu1 %703 }
 0x1d3   : > { %v1554_v35 = vmax.f32 %v704_v3, 1e-24 }
 0x1d5   : > { %1173 = vrsqrt.f32 %v1554_v35  ;;  %vm853_vm8 = vweird.f32 %v1554_v35 }
 0x1da   : > { %v706_v4 = vpop.xlane.xlu0 %705  ;;  %v698_v9 = vpop.xlane.xlu1 %697 }
 0x1db   : > { %v1557_v5 = vmax.f32 %v706_v4, 1e-24  ;;  %v1559_v6 = vpop.eup %1173  ;;  %v1564_v11 = vmax.f32 %v698_v9, 1e-24  ;;  %v420_v9 = vadd.s32 104, %v1588_v30 }
 0x1dc   : > { %v848_v43 = vmul.f32 %v1559_v6, %v1554_v35  ;;  %vm854_vm14 = vweird.f32 %v1559_v6 }
 0x1dd   : > { %1175 = vrsqrt.f32 %v1557_v5  ;;  %vm438_vm6 = vcmp.eq.s32.totalorder %v420_v9, %v1586_v28  ;;  %vm863_vm11 = vweird.f32 %v1557_v5  ;;  %vm1651_vm12 = vmor %vm853_vm8, %vm854_vm14 }
 0x1de   : > { %v849_v13 = vmul.f32 %v1559_v6, %v848_v43  ;;  %v1269_v43 = vmov 1.0  }
 0x1df   : > { %1078 = vmatpush.msk.msrb.mxu1 %vm440_vm3, %v1269_v43 }
 0x1e0   : > { %v850_v19 = vmul.f32 0.5, %v849_v13 }
 0x1e1   : > { %1079 = vmatpush.msk.msrb.mxu1 %vm439_vm4, %v1269_v43 }
 0x1e2   : > { %v700_v10 = vpop.xlane.xlu0 %699  ;;  %v692_v23 = vpop.xlane.xlu1 %691  ;;  %v851_v25 = vsub.f32 1.5, %v850_v19 }
 0x1e3   : > { %v1566_v12 = vpop.eup %1175  ;;  %v1569_v14 = vmax.f32 %v700_v10, 1e-24  ;;  %v1592_v32 = vmax.f32 %v692_v23, 1e-24  ;;  %1080 = vmatpush.msk.msrb.mxu1 %vm438_vm6, %v1269_v43 }
 0x1e4   : > { %v858_v18 = vmul.f32 %v1566_v12, %v1557_v5  ;;  %vm864_vm0 = vweird.f32 %v1566_v12  ;;  %v1607_v42 = vmul.f32 %v1559_v6, %v851_v25 }
 0x1e5   : > { %vm833_vm8 = vweird.f32 %v1569_v14 }
 0x1e6   : > { %v859_v22 = vmul.f32 %v1566_v12, %v858_v18 }
 0x1e8   : > { %v860_v38 = vmul.f32 0.5, %v859_v22 }
 0x1ea   : > { %v710_v7 = vpop.xlane.xlu2 %709  ;;  %v694_v33 = vpop.xlane.xlu0 %693  ;;  %v861_v3 = vsub.f32 1.5, %v860_v38  ;;  %v417_v38 = vadd.s32 80, %v1588_v30 }
 0x1eb   : > { %v726_v8 = vmax.f32 %v710_v7, 1e-24  ;;  %v1609_v44 = vmax.f32 %v694_v33, 1e-24  ;;  %v686_v33 = vpop.xlane.xlu1 %685 }
 0x1ec   : > { %v862_v23 = vmul.f32 %v1566_v12, %v861_v3  ;;  %vm435_vm14 = vcmp.eq.s32.totalorder %v417_v38, %v1586_v28  ;;  %v1682_v0 = vmax.f32 %v686_v33, 1e-24 }
 0x1ed   : > { %1177 = vrsqrt.f32 %v726_v8  ;;  %vm883_vm1 = vweird.f32 %v726_v8 }
 0x1ee   : > { %1179 = vrsqrt.f32 %v1564_v11 }
 0x1f2   : > { %v708_v15 = vpop.xlane.xlu2 %707 }
 0x1f3   : > { %v1571_v16 = vmax.f32 %v708_v15, 1e-24  ;;  %v1178_v17 = vpop.eup %1177 }
 0x1f4   : > { %v878_v20 = vmul.f32 %v1178_v17, %v726_v8  ;;  %v1579_v27 = vpop.eup %1179  ;;  %vm884_vm15 = vweird.f32 %v1178_v17 }
 0x1f5   : > { %1181 = vrsqrt.f32 %v1571_v16  ;;  %v818_v41 = vmul.f32 %v1579_v27, %v1564_v11  ;;  %vm885_vm2 = vmor %vm883_vm1, %vm884_vm15  ;;  %vm873_vm7 = vweird.f32 %v1571_v16 }
 0x1f6   : > { %1183 = vrsqrt.f32 %v1569_v14  ;;  %v879_v21 = vmul.f32 %v1178_v17, %v878_v20  ;;  %v418_v20 = vadd.s32 88, %v1588_v30  ;;  %vm1662_vm15 = vmor %vm863_vm11, %vm864_vm0  ;;  %vm824_vm11 = vweird.f32 %v1579_v27 }
 0x1f7   : > { %v819_v10 = vmul.f32 %v1579_v27, %v818_v41  ;;  %v866_v41 = vsel %vm1662_vm15, %v1566_v12, %v862_v23 }
 0x1f8   : > { %v880_v26 = vmul.f32 0.5, %v879_v21  ;;  %vm436_vm13 = vcmp.eq.s32.totalorder %v418_v20, %v1586_v28 }
 0x1f9   : > { %v1640_v24 = vmul.f32 0.5, %v819_v10  ;;  %v900_v10 = vmul.f32 %v866_v41, %v1460_v58  ;;  %v413_v58 = vadd.s32 48, %v1588_v30 }
 0x1fa   : > { %v702_v29 = vpop.xlane.xlu2 %701  ;;  %v881_v36 = vsub.f32 1.5, %v880_v26 }
 0x1fb   : > { %v1590_v31 = vpop.eup %1181  ;;  %v1594_v34 = vmax.f32 %v702_v29, 1e-24 }
 0x1fc   : > { %v1597_v37 = vpop.eup %1183  ;;  %v868_v39 = vmul.f32 %v1590_v31, %v1571_v16  ;;  %v882_v60 = vmul.f32 %v1178_v17, %v881_v36  ;;  %vm874_vm5 = vweird.f32 %v1590_v31  ;;  %v688_v36 = vpop.xlane.xlu0 %687 }
 0x1fd   : > { %1185 = vrsqrt.f32 %v1594_v34  ;;  %v828_v62 = vmul.f32 %v1597_v37, %v1569_v14  ;;  %vm875_vm9 = vmor %vm873_vm7, %vm874_vm5  ;;  %v1684_v12 = vmax.f32 %v688_v36, 1e-24  ;;  %vm843_vm4 = vweird.f32 %v1594_v34 }
 0x1fe   : > { %v869_v59 = vmul.f32 %v1590_v31, %v868_v39  ;;  %v886_v7 = vsel %vm885_vm2, %v1178_v17, %v882_v60  ;;  %1187 = vrsqrt.f32 %v1592_v32  ;;  %v419_v17 = vadd.s32 96, %v1588_v30 }
 0x1ff   : > { %v902_v8 = vmul.f32 %v886_v7, %v1474_v1  ;;  %v829_v19 = vmul.f32 %v1597_v37, %v828_v62  ;;  %1189 = vrsqrt.f32 %v1609_v44  ;;  %v416_v39 = vadd.s32 72, %v1588_v30 }
 0x200   : > { %v870_v4 = vmul.f32 0.5, %v869_v59  ;;  %vm437_vm10 = vcmp.eq.s32.totalorder %v419_v17, %v1586_v28  ;;  %v821_v60 = vsub.f32 1.5, %v1640_v24  ;;  %v415_v62 = vadd.s32 64, %v1588_v30 }
 0x201   : > { %903 = vmatpush.xpose.msra.mxu3 %v902_v8  ;;  %1081 = vmatpush.msk.msrb.mxu1 %vm437_vm10, %v1269_v43  ;;  %v830_v29 = vmul.f32 0.5, %v829_v19  ;;  %vm434_vm0 = vcmp.eq.s32.totalorder %v416_v39, %v1586_v28  ;;  %v412_v17 = vadd.s32 40, %v1588_v30  ;;  %vm834_vm6 = vweird.f32 %v1597_v37 }
 0x202   : > { %v871_v13 = vsub.f32 1.5, %v870_v4  ;;  %v696_v15 = vpop.xlane.xlu2 %695  ;;  %vm433_vm1 = vcmp.eq.s32.totalorder %v415_v62, %v1586_v28  ;;  %vm431_vm7 = vcmp.eq.s32.totalorder %v413_v58, %v1586_v28  ;;  %vm1734_vm10 = vmor %vm833_vm8, %vm834_vm6  ;;  %v822_v33 = vmul.f32 %v1579_v27, %v821_v60 }
 0x203   : > { %v1626_v18 = vpop.eup %1185  ;;  %v1630_v1 = vmax.f32 %v696_v15, 1e-24  ;;  %1082 = vmatpush.msk.msrb.mxu1 %vm436_vm13, %v1269_v43  ;;  %v831_v7 = vsub.f32 1.5, %v830_v29  ;;  %vm823_vm13 = vweird.f32 %v1564_v11  ;;  %v409_v11 = vadd.s32 16, %v1588_v30 }
 0x204   : > { %v838_v21 = vmul.f32 %v1626_v18, %v1594_v34  ;;  %v872_v22 = vmul.f32 %v1590_v31, %v871_v13  ;;  %v1657_v35 = vpop.eup %1187  ;;  %vm844_vm2 = vweird.f32 %v1626_v18  ;;  %vm1762_vm15 = vmor %vm823_vm13, %vm824_vm11  ;;  %vm773_vm13 = vweird.f32 %v1684_v12 }
 0x205   : > { %1191 = vrsqrt.f32 %v1630_v1  ;;  %v1676_v59 = vpop.eup %1189  ;;  %1083 = vmatpush.msk.msrb.mxu1 %vm435_vm14, %v1269_v43  ;;  %v788_v19 = vmul.f32 %v1657_v35, %v1592_v32  ;;  %vm1714_vm5 = vmor %vm843_vm4, %vm844_vm2  ;;  %v832_v23 = vmul.f32 %v1597_v37, %v831_v7  ;;  %vm794_vm8 = vweird.f32 %v1657_v35 }
 0x206   : > { %v839_v16 = vmul.f32 %v1626_v18, %v838_v21  ;;  %v876_v25 = vsel %vm875_vm9, %v1590_v31, %v872_v22  ;;  %v798_v8 = vmul.f32 %v1676_v59, %v1609_v44  ;;  %vm430_vm9 = vcmp.eq.s32.totalorder %v412_v17, %v1586_v28  ;;  %v400_v17 = vpop.f32.mrf.mxu1 }
 0x207   : > { %v901_v5 = vmul.f32 %v876_v25, %v1470_v63  ;;  %v856_v63 = vsel %vm1651_vm12, %v1559_v6, %v1607_v42  ;;  %v414_v6 = vadd.s32 56, %v1588_v30  ;;  %1084 = vmatpush.msk.msrb.mxu1 %vm434_vm0, %v1269_v43  ;;  %v410_v25 = vadd.s32 24, %v1588_v30 }
 0x208   : > { %v840_v40 = vmul.f32 0.5, %v839_v16  ;;  %v899_v21 = vmul.f32 %v856_v63, %v1454_v55  ;;  %v799_v24 = vmul.f32 %v1676_v59, %v798_v8  ;;  %v411_v55 = vadd.s32 32, %v1588_v30 }
 0x209   : > { %904 = vmatpush.xpose.msra.mxu3 %v901_v5  ;;  %vm432_vm3 = vcmp.eq.s32.totalorder %v414_v6, %v1586_v28  ;;  %1085 = vmatpush.msk.msrb.mxu1 %vm433_vm1, %v1269_v43  ;;  %v789_v26 = vmul.f32 %v1657_v35, %v788_v19  ;;  %v836_v31 = vsel %vm1734_vm10, %v1597_v37, %v832_v23  ;;  %v408_v37 = vadd.s32 8, %v1588_v30  ;;  %v680_v6 = vpop.xlane.xlu1 %679 }
 0x20a   : > { %v841_v3 = vsub.f32 1.5, %v840_v40  ;;  %v690_v4 = vpop.xlane.xlu2 %689  ;;  %vm429_vm12 = vcmp.eq.s32.totalorder %v411_v55, %v1586_v28  ;;  %v800_v39 = vmul.f32 0.5, %v799_v24  ;;  %v682_v40 = vpop.xlane.xlu0 %681  ;;  %vm428_vm14 = vcmp.eq.s32.totalorder %v410_v25, %v1586_v28 }
 0x20b   : > { %v1688_v42 = vpop.eup %1191  ;;  %v1690_v9 = vmax.f32 %v690_v4, 1e-24  ;;  %1086 = vmatpush.msk.msrb.mxu1 %vm432_vm3, %v1269_v43  ;;  %v790_v60 = vmul.f32 0.5, %v789_v26  ;;  %v897_v62 = vmul.f32 %v836_v31, %v1448_v52  ;;  %v1778_v7 = vmax.f32 %v682_v40, 1e-24 }
 0x20c   : > { %v808_v13 = vmul.f32 %v1688_v42, %v1630_v1  ;;  %v842_v15 = vmul.f32 %v1626_v18, %v841_v3  ;;  %v826_v3 = vsel %vm1762_vm15, %v1579_v27, %v822_v33  ;;  %vm427_vm0 = vcmp.eq.s32.totalorder %v409_v11, %v1586_v28 }
 0x20d   : > { %1193 = vrsqrt.f32 %v1690_v9  ;;  %905 = vmatpush.xpose.msra.mxu3 %v900_v10  ;;  %1087 = vmatpush.msk.msrb.mxu1 %vm431_vm7, %v1269_v43  ;;  %v801_v52 = vsub.f32 1.5, %v800_v39  ;;  %vm814_vm1 = vweird.f32 %v1688_v42  ;;  %vm426_vm2 = vcmp.eq.s32.totalorder %v408_v37, %v1586_v28 }
 0x20e   : > { %1195 = vrsqrt.f32 %v1684_v12  ;;  %v809_v20 = vmul.f32 %v1688_v42, %v808_v13  ;;  %v846_v34 = vsel %vm1714_vm5, %v1626_v18, %v842_v15  ;;  %v791_v13 = vsub.f32 1.5, %v790_v60 }
 0x20f   : > { %1197 = vrsqrt.f32 %v1682_v0  ;;  %v898_v5 = vmul.f32 %v846_v34, %v1450_v53  ;;  %1088 = vmatpush.msk.msrb.mxu1 %vm430_vm9, %v1269_v43  ;;  %v1791_v15 = vmax.f32 %v680_v6, 1e-24  ;;  %vm813_vm3 = vweird.f32 %v1630_v1 }
 0x210   : > { %v810_v16 = vmul.f32 0.5, %v809_v20  ;;  %v896_v58 = vmul.f32 %v826_v3, %v1444_v50  ;;  %vm1800_vm4 = vmor %vm813_vm3, %vm814_vm1  ;;  %vm425_vm5 = vcmp.eq.s32.totalorder %v1588_v30, %v1586_v28  ;;  %v802_v22 = vmul.f32 %v1676_v59, %v801_v52 }
 0x211   : > { %906 = vmatpush.xpose.msra.mxu3 %v899_v21  ;;  %1089 = vmatpush.msk.msrb.mxu1 %vm429_vm12, %v1269_v43  ;;  %vm804_vm6 = vweird.f32 %v1676_v59  ;;  %vm793_vm7 = vweird.f32 %v1592_v32  ;;  %vm803_vm9 = vweird.f32 %v1609_v44  ;;  %v792_v28 = vmul.f32 %v1657_v35, %v791_v13 }
 0x212   : > { %v684_v29 = vpop.xlane.xlu2 %683  ;;  %v811_v41 = vsub.f32 1.5, %v810_v16  ;;  %vm805_vm10 = vmor %vm803_vm9, %vm804_vm6  ;;  %vm783_vm15 = vweird.f32 %v1690_v9  ;;  %vm743_vm9 = vweird.f32 %v1778_v7 }
 0x213   : > { %v1743_v14 = vpop.eup %1193  ;;  %v1745_v36 = vmax.f32 %v684_v29, 1e-24  ;;  %1090 = vmatpush.msk.msrb.mxu1 %vm428_vm14, %v1269_v43  ;;  %v806_v55 = vsel %vm805_vm10, %v1676_v59, %v802_v22  ;;  %vm1829_vm11 = vmor %vm793_vm7, %vm794_vm8 }
 0x214   : > { %v1752_v38 = vpop.eup %1195  ;;  %v778_v63 = vmul.f32 %v1743_v14, %v1690_v9  ;;  %v812_v27 = vmul.f32 %v1688_v42, %v811_v41  ;;  %v894_v26 = vmul.f32 %v806_v55, %v1436_v46  ;;  %v796_v29 = vsel %vm1829_vm11, %v1657_v35, %v792_v28 }
 0x215   : > { %907 = vmatpush.xpose.msra.mxu3 %v898_v5  ;;  %v768_v4 = vmul.f32 %v1752_v38, %v1684_v12  ;;  %1199 = vrsqrt.f32 %v1745_v36  ;;  %v1782_v10 = vpop.eup %1197  ;;  %1091 = vmatpush.msk.msrb.mxu1 %vm427_vm0, %v1269_v43  ;;  %vm784_vm12 = vweird.f32 %v1743_v14  ;;  %v403_v5 = vpop.f32.mrf.mxu1  ;;  %vm774_vm14 = vweird.f32 %v1752_v38 }
 0x216   : > { %v779_v8 = vmul.f32 %v1743_v14, %v778_v63  ;;  %v758_v19 = vmul.f32 %v1782_v10, %v1682_v0  ;;  %1201 = vrsqrt.f32 %v1778_v7  ;;  %v816_v50 = vsel %vm1800_vm4, %v1688_v42, %v812_v27  ;;  %vm785_vm0 = vmor %vm783_vm15, %vm784_vm12 }
 0x217   : > { %v769_v20 = vmul.f32 %v1752_v38, %v768_v4  ;;  %1092 = vmatpush.msk.msrb.mxu1 %vm426_vm2, %v1269_v43  ;;  %1203 = vrsqrt.f32 %v1791_v15  ;;  %v895_v24 = vmul.f32 %v816_v50, %v1440_v48  ;;  %v893_v31 = vmul.f32 %v796_v29, %v1466_v61  ;;  %vm775_vm1 = vmor %vm773_vm13, %vm774_vm14 }
 0x218   : > { %v780_v1 = vmul.f32 0.5, %v779_v8  ;;  %v759_v30 = vmul.f32 %v1782_v10, %v758_v19  ;;  %vm763_vm2 = vweird.f32 %v1682_v0  ;;  %vm764_vm3 = vweird.f32 %v1782_v10 }
 0x219   : > { %908 = vmatpush.xpose.msra.mxu3 %v897_v62  ;;  %1093 = vmatpush.msk.msrb.mxu1 %vm425_vm5, %v1269_v43  ;;  %v770_v42 = vmul.f32 0.5, %v769_v20  ;;  %vm765_vm4 = vmor %vm763_vm2, %vm764_vm3  ;;  %vm753_vm6 = vweird.f32 %v1745_v36  ;;  %vm733_vm12 = vweird.f32 %v1791_v15  ;;  %v929_v27 = vstv %s333_s22 }
 0x21a   : > { %489 = vmatmul.f32.vlgmr.msrb.gmra.mxu1 %v400_v17  ;;  %v781_v16 = vsub.f32 1.5, %v780_v1  ;;  %v760_v25 = vmul.f32 0.5, %v759_v30 }
 0x21b   : > { %v1814_v23 = vpop.eup %1199  ;;  %v771_v48 = vsub.f32 1.5, %v770_v42 }
 0x21c   : > { %v748_v34 = vmul.f32 %v1814_v23, %v1745_v36  ;;  %v1202_v43 = vpop.eup %1201  ;;  %v782_v32 = vmul.f32 %v1743_v14, %v781_v16  ;;  %v761_v46 = vsub.f32 1.5, %v760_v25  ;;  %vm754_vm5 = vweird.f32 %v1814_v23 }
 0x21d   : > { %909 = vmatpush.xpose.msra.mxu3 %v896_v58  ;;  %v1204_v18 = vpop.eup %1203  ;;  %v738_v33 = vmul.f32 %v1202_v43, %v1778_v7  ;;  %v772_v63 = vmul.f32 %v1752_v38, %v771_v48  ;;  %vm755_vm7 = vmor %vm753_vm6, %vm754_vm5  ;;  %vm744_vm8 = vweird.f32 %v1202_v43 }
 0x21e   : > { %v749_v59 = vmul.f32 %v1814_v23, %v748_v34  ;;  %v728_v35 = vmul.f32 %v1204_v18, %v1791_v15  ;;  %v786_v41 = vsel %vm785_vm0, %v1743_v14, %v782_v32  ;;  %v762_v37 = vmul.f32 %v1782_v10, %v761_v46  ;;  %vm745_vm10 = vmor %vm743_vm9, %vm744_vm8 }
 0x21f   : > { %v739_v39 = vmul.f32 %v1202_v43, %v738_v33  ;;  %v892_v9 = vmul.f32 %v786_v41, %v1458_v57  ;;  %v776_v61 = vsel %vm775_vm1, %v1752_v38, %v772_v63  ;;  %vm734_vm11 = vweird.f32 %v1204_v18 }
 0x220   : > { %v750_v40 = vmul.f32 0.5, %v749_v59  ;;  %v729_v12 = vmul.f32 %v1204_v18, %v728_v35  ;;  %v891_v60 = vmul.f32 %v776_v61, %v1452_v54  ;;  %v766_v3 = vsel %vm765_vm4, %v1782_v10, %v762_v37  ;;  %vm735_vm13 = vmor %vm733_vm12, %vm734_vm11 }
 0x221   : > { %910 = vmatpush.xpose.msra.mxu3 %v895_v24  ;;  %v740_v53 = vmul.f32 0.5, %v739_v39  ;;  %v890_v57 = vmul.f32 %v766_v3, %v1446_v51 }
 0x222   : > { %492 = vmatmul.f32.gmra.mxu1 %v403_v5  ;;  %v751_v11 = vsub.f32 1.5, %v750_v40  ;;  %v730_v14 = vmul.f32 0.5, %v729_v12 }
 0x223   : > { %v741_v62 = vsub.f32 1.5, %v740_v53 }
 0x224   : > { %v752_v0 = vmul.f32 %v1814_v23, %v751_v11  ;;  %v731_v38 = vsub.f32 1.5, %v730_v14 }
 0x225   : > { %911 = vmatpush.xpose.msra.mxu3 %v894_v26  ;;  %v742_v6 = vmul.f32 %v1202_v43, %v741_v62 }
 0x226   : > { %v756_v4 = vsel %vm755_vm7, %v1814_v23, %v752_v0  ;;  %v732_v52 = vmul.f32 %v1204_v18, %v731_v38 }
 0x227   : > { %v889_v54 = vmul.f32 %v756_v4, %v1442_v49  ;;  %v746_v10 = vsel %vm745_vm10, %v1202_v43, %v742_v6  ;;  %v926_v49 = vstv %s334_s15 }
 0x228   : > { %v888_v51 = vmul.f32 %v746_v10, %v1438_v47  ;;  %v736_v36 = vsel %vm735_vm13, %v1204_v18, %v732_v52 }
 0x229   : > { %912 = vmatpush.xpose.msra.mxu3 %v893_v31  ;;  %v887_v8 = vmul.f32 %v736_v36, %v1434_v45 }
 0x22d   : > { %913 = vmatpush.xpose.msra.mxu3 %v892_v9 }
 0x231   : > { %914 = vmatpush.xpose.msra.mxu3 %v891_v60 }
 0x235   : > { %915 = vmatpush.xpose.msra.mxu3 %v890_v57 }
 0x239   : > { %916 = vmatpush.xpose.msra.mxu3 %v889_v54 }
 0x23d   : > { %917 = vmatpush.xpose.msra.mxu3 %v888_v51 }
 0x241   : > { %918 = vmatpush.xpose.msra.mxu3 %v887_v8 }
 0x244   : > { %919 = vmatmul.f32.vlgmr.msra.gmra.mxu3 %v1545_v56 }
 0x24c   : > { %922 = vmatmul.f32.gmra.mxu3 %v1551_v2 }
 0x297   : > { %v490_v7 = vpop.f32.mrf.mxu1 }
 0x298   : > { %v927_v13 = vadd.f32 %v926_v49, %v490_v7 }
 0x29a   : > { %v930_v47 = vmul.f32 %v929_v27, %v927_v13 }
 0x29c   : > { %932 = vst [vmem:[%s314_s24] sm:$0xff] %v930_v47 }
 0x29f   : > { %v493_v15 = vpop.f32.mrf.mxu1 }
 0x2a0   : > { %v928_v58 = vadd.f32 %v926_v49, %v493_v15 }
 0x2a2   : > { %v931_v45 = vmul.f32 %v929_v27, %v928_v58 }
 0x2a4   : > { %933 = vst [vmem:[%s314_s24 + $0x10] sm:$0xff] %v931_v45 }
 0x2c7   : > { %v920_v17 = vpop.f32.mrf.mxu3 }
 0x2c8   : > { %v934_v56 = vadd.f32 %v926_v49, %v920_v17 }
 0x2ca   : > { %v936_v2 = vmul.f32 %v934_v56, %v929_v27 }
 0x2cc   : > { %938 = vst [vmem:[%s314_s24 + $0x8] sm:$0xff] %v936_v2 }
 0x2cf   : > { %v923_v19 = vpop.f32.mrf.mxu3 }
 0x2d0   : > { %v935_v20 = vadd.f32 %v926_v49, %v923_v19 }
 0x2d2   : > { %v937_v21 = vmul.f32 %v935_v20, %v929_v27 }
 0x2d4   : > { %939 = vst [vmem:[%s314_s24 + $0x18] sm:$0xff] %v937_v21 }
 0x2d5   : > { %1232 = shalt.err (!%p1229_p3)
}
 0x2d6   : > { %s1270_s21 = smov 256   ;;  %s1271_s23 = smov 16  }
 0x2d7   : > { %1122 = dma.vmem_to_hbm [thread:$0]  (%p1356_p5), %s954_s10, 512, %s956_s11, %s941_s16, %s1270_s21, %s1270_s21, %s1271_s23  }
 0x2d8 PF: > { %p1128_p4 = scmp.ge.s32.totalorder %s1267_s8, 2  ;;  %s970_s24 = sand.u32 1, %s1255_s28  }
 0x2d9   : > { %s971_s25 = scalar_lea.sflag [#allocation5], %s970_s24 }
 0x2da   : > { %p1125_p7 = pnand %p1128_p4, %p1360_p6 }
 0x2dc   : > { %p1126_p8 = pneg %p1125_p7 }
 0x2de   : > { %1250 = dma.done.wait (%p1126_p8), %s971_s25, 512  }
 0x2df   : > { %1252 = vsyncadd (%p1126_p8), %s971_s25, 4294966784  ;;  %p19_p9 = scmp.ge.s32.totalorder %s1343_s9, 4   ;;  %s1923_s28 = smov %s1259_s29 }
 0x2e0   : > { %s1924_s29 = smov %s1263_s30  ;;  %s1925_s30 = smov %s1354_s12 }
 0x2e1   : > { %s1926_s8 = smov %s1343_s9  ;;  %21 = sbr.rel (!%p19_p9) target bundleno = 6 (0x6), region = 92 }
 0x2e6   :  { %977 = vsyncpa [#allocation5], 1 }
 0x2e7   :  { %979 = vsyncpa [#allocation5 + $0x1], 1 }

// kernel: tpu_custom_call.1
= control target key start
LH: loop header
LB: loop body
LE: loop exit
PB: predicated region body
PF: predicated region fallthrough
CT: control target
= control target key end

     0   :  { %s1899_s0 = inlined_call_operand.<no memory space> [shape: f32[1], index: 0, kind: input, shape index: {}]   ;;  %s1900_s1 = inlined_call_operand.<no memory space> [shape: f32[1], index: 1, kind: input, shape index: {}]   ;;  %s1901_s2 = inlined_call_operand.vmem [shape: s32[2,1,128], index: 2, kind: input, shape index: {}]   ;;  %s1902_s3 = inlined_call_operand.vmem [shape: f32[2,16,128], index: 3, kind: input, shape index: {}]   ;;  %s1903_s4 = inlined_call_operand.vmem [shape: f32[128,128], index: 4, kind: input, shape index: {}]   ;;  %s1904_s5 = inlined_call_operand.vmem [shape: f32[2,10,128], index: 5, kind: input, shape index: {}]   ;;  %s1905_s6 = inlined_call_operand.vmem [shape: f32[2,128,10], index: 6, kind: input, shape index: {}]   ;;  %s1906_s7 = inlined_call_operand.hbm [shape: f32[2,16,256], index: 7, kind: output, shape index: {}]  }
   0x1   :  { %12 = sst [smem:[#allocation2]] %s1899_s0 }
   0x2   :  { %13 = sst [smem:[#allocation3]] %s1900_s1 }
   0x3   :  { %14 = vsyncpa [#allocation5], 0 }
   0x4   :  { %16 = vsyncpa [#allocation5 + $0x1], 0  ;;  %s1318_s28 = smov 0   ;;  %s1320_s29 = smov 0  }
   0x5   :  { %s1322_s30 = smov 0   ;;  %s1324_s8 = smov 0  }
   0x6 LB: > { %s1339_s0 = sadd.s32 4294967295, %s1267_s8   ;;  %s1051_s1 = sadd.s32 4294967294, %s1267_s8   ;;  %s1267_s8 = sphi %s1324_s8, %s1926_s8   ;;  %s1263_s30 = sphi %s1322_s30, %s1925_s30   ;;  %s1259_s29 = sphi %s1320_s29, %s1924_s29   ;;  %s1255_s28 = sphi %s1318_s28, %s1923_s28  }
   0x7   : > { %s1343_s9 = sadd.s32 1, %s1267_s8   ;;  %s196_s10 = sadd.s32 1, %s1263_s30 }
   0x8   : > { %s193_s11 = ssub.s32 %s1267_s8, %s1343_s9  ;;  %p206_p0 = scmp.ne.s32.totalorder %s1263_s30, %s1259_s29 }
   0x9   : > { %p194_p1 = scmp.eq.s32.totalorder %s193_s11, 0  ;;  %p207_p2 = scmp.eq.s32.totalorder %s1339_s0, 1 }
   0xa   : > { %p212_p3 = scmp.ne.s32.totalorder %s1259_s29, %s1255_s28  ;;  %p213_p4 = scmp.eq.s32.totalorder %s1051_s1, 1 }
   0xb   : > { %s1354_s12 = scalar_select %p194_p1, %s1263_s30, %s196_s10  }
   0xc   : > { %p1356_p5 = por %p207_p2, %p206_p0  ;;  %p1360_p6 = por %p213_p4, %p212_p3 }
   0xd   : > { %p1054_p7 = scmp.ge.s32.totalorder %s1267_s8, 1  ;;  %p270_p8 = scmp.lt.s32.totalorder %s1267_s8, 3 }
   0xf   : > { %p271_p9 = pnand %p1054_p7, %p270_p8 }
  0x10   : > { %p315_p10 = scmp.lt.s32.totalorder (!%p271_p9), %s1339_s0, 1  ;;  %s312_s21 = sand.u32 (!%p271_p9), 1, %s1259_s29  }
  0x11   : > { %274 = sbr.rel (%p271_p9) target bundleno = 728 (0x2d8), region = 48  ;;  %s1119_s25 = sshll.u32 (!%p271_p9), %s1339_s0, 5 }
  0x12   : > { %s952_s1 = scalar_lea.hbm (!%p271_p9), %s1906_s7, %s1119_s25  ;;  %s1225_s20 = scalar_lea.hbm (!%p271_p9), %s1906_s7, 64 }
  0x13   : > { %s955_s11 = sshll.u32 (!%p271_p9), %s952_s1, 4  ;;  %s956_s11 = int_to_ptr.hbm [resolvable:$true] %s955_s11 }
  0x14   : > { %s1219_s17 = sshra.s32 (!%p271_p9), %s956_s11, 4  ;;  %s1220_s17 = int_to_ptr.hbm [resolvable:$true] %s1219_s17 }
  0x15   : > { %s1221_s18 = scalar_lea.hbm (!%p271_p9), %s1220_s17, 32  ;;  %p1226_p0 = scmp.lt.s32.totalorder (!%p271_p9), %s1220_s17, %s1906_s7 }
  0x16   : > { %s1368_s15 = scalar_select %p315_p10, %s1339_s0, 1  ;;  %vm502_vm0 = vcmask 1041408   ;;  %vm546_vm7 = vcmask 80896  }
  0x17   : > { %p1222_p11 = scmp.ne.s32.totalorder %s1220_s17, %s1221_s18  ;;  %p1227_p1 = scmp.lt.s32.totalorder %s1225_s20, %s1221_s18 }
  0x18   : > { %s1116_s16 = sshll.u32 %s1368_s15, 4  ;;  %s317_s22 = scalar_lea.vmem %s1901_s2, %s1368_s15 }
  0x19   : > { %s327_s19 = scalar_lea.vmem %s1904_s5, %s1116_s16  ;;  %s1118_s23 = sshll.u32 %s1368_s15, 7 }
  0x1a   : > { %v497_v0 = vld [vmem:[%s327_s19 + $0x8] sm:$0x3]  ;;  %v496_v3 = vld [vmem:[%s327_s19] sm:$0xff]  ;;  %s1387_s26 = scalar_lea.vmem %s1905_s6, %s1118_s23  ;;  %s322_s10 = scalar_lea.vmem %s1902_s3, %s1116_s16 }
  0x1b   : > { %v499_v1 = vmul.f32 %v497_v0, %v497_v0  ;;  %v498_v4 = vmul.f32 %v496_v3, %v496_v3  ;;  %v537_v25 = vld [vmem:[%s1387_s26 + $0x38] sm:$0xff]  ;;  %v530_v26 = vld [vmem:[%s1387_s26] sm:$0xff]  ;;  %v531_v28 = vld [vmem:[%s1387_s26 + $0x8] sm:$0xff]  ;;  %s334_s15 = sld [smem:[#allocation3]]  ;;  %s1055_s23 = sshll.u32 %s312_s21, 5 }
  0x1c   : > { %v538_v27 = vld [vmem:[%s1387_s26 + $0x40] sm:$0xff]  ;;  %v539_v29 = vld [vmem:[%s1387_s26 + $0x48] sm:$0xff]  ;;  %v532_v30 = vld [vmem:[%s1387_s26 + $0x10] sm:$0xff]  ;;  %s314_s24 = scalar_lea.vmem [#allocation4], %s1055_s23  ;;  %s941_s16 = scalar_lea.sflag [#allocation5], %s312_s21 }
  0x1d   : > { %v503_v2 = vsel %vm502_vm0, %v499_v1, 0.0  ;;  %v540_v31 = vld [vmem:[%s1387_s26 + $0x50] sm:$0xff]  ;;  %v533_v32 = vld [vmem:[%s1387_s26 + $0x18] sm:$0xff]  ;;  %v534_v34 = vld [vmem:[%s1387_s26 + $0x20] sm:$0xff]  ;;  %p1223_p12 = pnand %p1222_p11, %p1356_p5  ;;  %p1228_p2 = por %p1227_p1, %p1226_p0 }
  0x1e   : > { %504 = vadd.xlane.f32.xlu0 %v503_v2  ;;  %v541_v33 = vld [vmem:[%s1387_s26 + $0x58] sm:$0xff]  ;;  %v1414_v35 = vld [vmem:[%s322_s10] sm:$0xff]  ;;  %v535_v38 = vld [vmem:[%s1387_s26 + $0x28] sm:$0xff] }
  0x1f   : > { %v337_v36 = vmul.f32 %v1414_v35, %v1414_v35  ;;  %v542_v37 = vld [vmem:[%s1387_s26 + $0x60] sm:$0xff]  ;;  %v543_v39 = vld [vmem:[%s1387_s26 + $0x68] sm:$0xff]  ;;  %v536_v40 = vld [vmem:[%s1387_s26 + $0x30] sm:$0xff]  ;;  %p1224_p13 = pneg %p1223_p12 }
  0x20   : > { %v544_v41 = vld [vmem:[%s1387_s26 + $0x70] sm:$0xff]  ;;  %v545_v42 = vld [vmem:[%s1387_s26 + $0x78] sm:$0xff]  ;;  %v1430_v43 = vld [vmem:[%s322_s10 + $0x8] sm:$0xff]  ;;  %s953_s10 = sshll.u32 %s314_s24, 4  ;;  %s954_s10 = int_to_ptr.vmem [resolvable:$true] %s953_s10 }
  0x21   : > { %339 = vadd.xlane.f32.xlu1 %v337_v36  ;;  %v338_v44 = vmul.f32 %v1430_v43, %v1430_v43  ;;  %v370_v36 = vld [vmem:[%s1903_s4 + $0x18] sm:$0xff]  ;;  %p1229_p3 = pnand %p1228_p2, %p1224_p13 }
  0x26   : > { %500 = vadd.xlane.f32.xlu0 %v498_v4 }
  0x29   : > { %341 = vadd.xlane.f32.xlu1 %v338_v44  ;;  %v367_v44 = vld [vmem:[%s1903_s4] sm:$0xff] }
  0x91   : > { %v505_v5 = vpop.xlane.xlu0 %504 }
  0x92   : > { %v507_v6 = vmax.f32 %v505_v5, 1e-24  ;;  %v382_v5 = vld [vmem:[%s1903_s4 + $0x78] sm:$0xff] }
  0x93   : > { %383 = vmatpush.msra.mxu1 %v382_v5 }
  0x94   : > { %1165 = vrsqrt.f32 %v507_v6  ;;  %vm524_vm2 = vweird.f32 %v507_v6 }
  0x99   : > { %v501_v7 = vpop.xlane.xlu0 %500 }
  0x9a   : > { %v1166_v8 = vpop.eup %1165  ;;  %v506_v9 = vmax.f32 %v501_v7, 1e-24 }
  0x9b   : > { %v519_v10 = vmul.f32 %v1166_v8, %v507_v6  ;;  %vm525_vm1 = vweird.f32 %v1166_v8 }
  0x9c   : > { %1167 = vrsqrt.f32 %v506_v9  ;;  %vm526_vm3 = vmor %vm524_vm2, %vm525_vm1  ;;  %vm514_vm5 = vweird.f32 %v506_v9 }
  0x9d   : > { %v520_v11 = vmul.f32 %v1166_v8, %v519_v10  ;;  %v380_v10 = vld [vmem:[%s1903_s4 + $0x68] sm:$0xff] }
  0x9f   : > { %v521_v12 = vmul.f32 0.5, %v520_v11  ;;  %v340_v11 = vpop.xlane.xlu1 %339 }
  0xa1   : > { %v522_v13 = vsub.f32 1.5, %v521_v12  ;;  %v343_v12 = vmax.f32 %v340_v11, 1e-24 }
  0xa2   : > { %v1168_v14 = vpop.eup %1167 }
  0xa3   : > { %v509_v15 = vmul.f32 %v1168_v14, %v506_v9  ;;  %v523_v16 = vmul.f32 %v1166_v8, %v522_v13  ;;  %vm515_vm4 = vweird.f32 %v1168_v14  ;;  %v381_v9 = vld [vmem:[%s1903_s4 + $0x70] sm:$0xff]  ;;  %v379_v13 = vld [vmem:[%s1903_s4 + $0x60] sm:$0xff]  ;;  %1169 = vrsqrt.f32 %v343_v12 }
  0xa4   : > { %vm516_vm6 = vmor %vm514_vm5, %vm515_vm4  ;;  %384 = vmatpush.msra.mxu1 %v381_v9  ;;  %vm351_vm8 = vweird.f32 %v343_v12 }
  0xa5   : > { %v510_v17 = vmul.f32 %v1168_v14, %v509_v15  ;;  %v527_v18 = vsel %vm526_vm3, %v1166_v8, %v523_v16 }
  0xa6   : > { %v529_v19 = vmul.f32 %v527_v18, %v497_v0  ;;  %385 = vmatpush.msra.mxu1 %v380_v10  ;;  %v376_v18 = vld [vmem:[%s1903_s4 + $0x48] sm:$0xff] }
  0xa7   : > { %v511_v20 = vmul.f32 0.5, %v510_v17  ;;  %v377_v17 = vld [vmem:[%s1903_s4 + $0x50] sm:$0xff] }
  0xa8   : > { %1094 = vmatpush.msk.msra.mxu0 %vm502_vm0, %v529_v19  ;;  %1120 = vmatpush.msk.msra.mxu2 %vm502_vm0, %v529_v19 }
  0xa9   : > { %v512_v21 = vsub.f32 1.5, %v511_v20  ;;  %386 = vmatpush.msra.mxu1 %v379_v13  ;;  %v1170_v19 = vpop.eup %1169 }
  0xaa   : > { %v346_v20 = vmul.f32 %v1170_v19, %v343_v12  ;;  %vm352_vm9 = vweird.f32 %v1170_v19 }
  0xab   : > { %v513_v22 = vmul.f32 %v1168_v14, %v512_v21  ;;  %v375_v21 = vld [vmem:[%s1903_s4 + $0x40] sm:$0xff]  ;;  %vm353_vm10 = vmor %vm351_vm8, %vm352_vm9 }
  0xad   : > { %v517_v23 = vsel %vm516_vm6, %v1168_v14, %v513_v22  ;;  %v378_v14 = vld [vmem:[%s1903_s4 + $0x58] sm:$0xff]  ;;  %v342_v22 = vpop.xlane.xlu1 %341 }
  0xae   : > { %v528_v24 = vmul.f32 %v517_v23, %v496_v3  ;;  %387 = vmatpush.msra.mxu1 %v378_v14  ;;  %v347_v23 = vmul.f32 %v1170_v19, %v346_v20 }
  0xb0   : > { %613 = vmatpush.msra.mxu0 %v528_v24  ;;  %1121 = vmatpush.msra.mxu2 %v528_v24  ;;  %v374_v24 = vld [vmem:[%s1903_s4 + $0x38] sm:$0xff] }
  0xb1   : > { %1102 = vmatmul.msk.f32.vlgmr.msra.gmra.mxu2 %vm546_vm7, %v537_v25  ;;  %1095 = vmatmul.msk.f32.vlgmr.msra.gmra.mxu0 %vm546_vm7, %v530_v26  ;;  %v344_v25 = vmax.f32 %v342_v22, 1e-24 }
  0xb2   : > { %388 = vmatpush.msra.mxu1 %v377_v17 }
  0xb3   : > { %1171 = vrsqrt.f32 %v344_v25  ;;  %vm361_vm11 = vweird.f32 %v344_v25 }
  0xb4   : > { %389 = vmatpush.msra.mxu1 %v376_v18 }
  0xb6   : > { %390 = vmatpush.msra.mxu1 %v375_v21 }
  0xb8   : > { %391 = vmatpush.msra.mxu1 %v374_v24  ;;  %v406_v24 = vlaneseq }
  0xb9   : > { %1103 = vmatmul.msk.f32.gmra.mxu2 %vm546_vm7, %v538_v27  ;;  %1096 = vmatmul.msk.f32.gmra.mxu0 %vm546_vm7, %v531_v28  ;;  %v348_v27 = vmul.f32 0.5, %v347_v23  ;;  %v373_v28 = vld [vmem:[%s1903_s4 + $0x30] sm:$0xff] }
  0xba   : > { %392 = vmatpush.msra.mxu1 %v373_v28  ;;  %v1586_v28 = vld [vmem:[%s317_s22] ss:$0 sm:$0xff]  ;;  %s333_s22 = sld [smem:[#allocation2]] }
  0xc1   : > { %1104 = vmatmul.msk.f32.gmra.mxu2 %vm546_vm7, %v539_v29  ;;  %1097 = vmatmul.msk.f32.gmra.mxu0 %vm546_vm7, %v532_v30  ;;  %v349_v29 = vsub.f32 1.5, %v348_v27  ;;  %v372_v30 = vld [vmem:[%s1903_s4 + $0x28] sm:$0xff] }
  0xc2   : > { %393 = vmatpush.msra.mxu1 %v372_v30  ;;  %v1588_v30 = vshrl.u32 %v406_v24, 7 }
  0xc9   : > { %1105 = vmatmul.msk.f32.gmra.mxu2 %vm546_vm7, %v540_v31  ;;  %1098 = vmatmul.msk.f32.gmra.mxu0 %vm546_vm7, %v533_v32  ;;  %v371_v31 = vld [vmem:[%s1903_s4 + $0x20] sm:$0xff]  ;;  %v350_v32 = vmul.f32 %v1170_v19, %v349_v29 }
  0xca   : > { %394 = vmatpush.msra.mxu1 %v371_v31 }
  0xcc   : > { %395 = vmatpush.msra.mxu1 %v370_v36 }
  0xd1   : > { %1106 = vmatmul.msk.f32.gmra.mxu2 %vm546_vm7, %v541_v33  ;;  %1099 = vmatmul.msk.f32.gmra.mxu0 %vm546_vm7, %v534_v34  ;;  %v1172_v33 = vpop.eup %1171 }
  0xd2   : > { %vm362_vm12 = vweird.f32 %v1172_v33 }
  0xd3   : > { %vm363_vm13 = vmor %vm361_vm11, %vm362_vm12 }
  0xd9   : > { %1107 = vmatmul.msk.f32.gmra.mxu2 %vm546_vm7, %v542_v37  ;;  %1100 = vmatmul.msk.f32.gmra.mxu0 %vm546_vm7, %v535_v38  ;;  %v356_v37 = vmul.f32 %v1172_v33, %v344_v25  ;;  %v369_v38 = vld [vmem:[%s1903_s4 + $0x10] sm:$0xff] }
  0xda   : > { %396 = vmatpush.msra.mxu1 %v369_v38 }
  0xe1   : > { %1108 = vmatmul.msk.f32.gmra.mxu2 %vm546_vm7, %v543_v39  ;;  %1101 = vmatmul.msk.f32.gmra.mxu0 %vm546_vm7, %v536_v40  ;;  %v357_v39 = vmul.f32 %v1172_v33, %v356_v37  ;;  %v354_v40 = vsel %vm353_vm10, %v1170_v19, %v350_v32 }
  0xe9   : > { %1109 = vmatmul.msk.f32.gmra.mxu2 %vm546_vm7, %v544_v41  ;;  %v368_v41 = vld [vmem:[%s1903_s4 + $0x8] sm:$0xff] }
  0xea   : > { %397 = vmatpush.msra.mxu1 %v368_v41 }
  0xec   : > { %398 = vmatpush.msra.mxu1 %v367_v44 }
  0xf1   : > { %1110 = vmatmul.msk.f32.gmra.mxu2 %vm546_vm7, %v545_v42  ;;  %v358_v42 = vmul.f32 0.5, %v357_v39 }
 0x12e   : > { %v1434_v45 = vpop.f32.mrf.mxu0 }
 0x12f   : > { %v663_v8 = vmul.f32 %v1434_v45, %v1434_v45 }
 0x134   : > { %v1436_v46 = vpop.f32.mrf.mxu2 }
 0x135   : > { %v670_v3 = vmul.f32 %v1436_v46, %v1436_v46 }
 0x136   : > { %v1438_v47 = vpop.f32.mrf.mxu0 }
 0x137   : > { %v664_v16 = vmul.f32 %v1438_v47, %v1438_v47 }
 0x13c   : > { %v1440_v48 = vpop.f32.mrf.mxu2 }
 0x13d   : > { %v671_v26 = vmul.f32 %v1440_v48, %v1440_v48 }
 0x13e   : > { %v1442_v49 = vpop.f32.mrf.mxu0 }
 0x144   : > { %v1444_v50 = vpop.f32.mrf.mxu2 }
 0x145   : > { %v672_v60 = vmul.f32 %v1444_v50, %v1444_v50 }
 0x146   : > { %v1446_v51 = vpop.f32.mrf.mxu0 }
 0x147   : > { %v666_v2 = vmul.f32 %v1446_v51, %v1446_v51 }
 0x14c   : > { %v1448_v52 = vpop.f32.mrf.mxu2 }
 0x14d   : > { %v673_v0 = vmul.f32 %v1448_v52, %v1448_v52 }
 0x14e   : > { %v1452_v54 = vpop.f32.mrf.mxu0 }
 0x14f   : > { %v667_v6 = vmul.f32 %v1452_v54, %v1452_v54 }
 0x154   : > { %v1450_v53 = vpop.f32.mrf.mxu2 }
 0x155   : > { %v674_v15 = vmul.f32 %v1450_v53, %v1450_v53 }
 0x156   : > { %v1458_v57 = vpop.f32.mrf.mxu0 }
 0x157   : > { %v668_v34 = vmul.f32 %v1458_v57, %v1458_v57 }
 0x15c   : > { %v1454_v55 = vpop.f32.mrf.mxu2 }
 0x15d   : > { %v675_v56 = vmul.f32 %v1454_v55, %v1454_v55 }
 0x15e   : > { %v1466_v61 = vpop.f32.mrf.mxu0 }
 0x15f   : > { %703 = vadd.xlane.f32.xlu1 %v675_v56  ;;  %v669_v62 = vmul.f32 %v1466_v61, %v1466_v61  ;;  %v1545_v56 = vmul.f32 %v354_v40, %v1414_v35  ;;  %v422_v40 = vadd.s32 120, %v1588_v30 }
 0x161   : > { %399 = vmatmul.f32.vlgmr.msra.gmra.mxu1 %v1545_v56  ;;  %vm440_vm3 = vcmp.eq.s32.totalorder %v422_v40, %v1586_v28 }
 0x164   : > { %v1460_v58 = vpop.f32.mrf.mxu2 }
 0x165   : > { %v676_v59 = vmul.f32 %v1460_v58, %v1460_v58 }
 0x167   : > { %705 = vadd.xlane.f32.xlu0 %v676_v59  ;;  %697 = vadd.xlane.f32.xlu1 %v672_v60  ;;  %v359_v59 = vsub.f32 1.5, %v358_v42 }
 0x169   : > { %v360_v60 = vmul.f32 %v1172_v33, %v359_v59 }
 0x16c   : > { %v1470_v63 = vpop.f32.mrf.mxu2 }
 0x16d   : > { %v677_v7 = vmul.f32 %v1470_v63, %v1470_v63 }
 0x16f   : > { %699 = vadd.xlane.f32.xlu0 %v673_v0  ;;  %691 = vadd.xlane.f32.xlu1 %v669_v62  ;;  %v665_v62 = vmul.f32 %v1442_v49, %v1442_v49  ;;  %v364_v0 = vsel %vm363_vm13, %v1172_v33, %v360_v60 }
 0x174   : > { %v1474_v1 = vpop.f32.mrf.mxu2 }
 0x175   : > { %v678_v4 = vmul.f32 %v1474_v1, %v1474_v1 }
 0x177   : > { %693 = vadd.xlane.f32.xlu0 %v670_v3  ;;  %709 = vadd.xlane.f32.xlu2 %v678_v4 }
 0x178   : > { %685 = vadd.xlane.f32.xlu1 %v666_v2  ;;  %v1551_v2 = vmul.f32 %v364_v0, %v1430_v43  ;;  %v421_v0 = vadd.s32 112, %v1588_v30 }
 0x17a   : > { %402 = vmatmul.f32.gmra.mxu1 %v1551_v2  ;;  %vm439_vm4 = vcmp.eq.s32.totalorder %v421_v0, %v1586_v28 }
 0x17f   : > { %707 = vadd.xlane.f32.xlu2 %v677_v7  ;;  %687 = vadd.xlane.f32.xlu0 %v667_v6 }
 0x180   : > { %679 = vadd.xlane.f32.xlu1 %v663_v8 }
 0x187   : > { %701 = vadd.xlane.f32.xlu2 %v674_v15  ;;  %681 = vadd.xlane.f32.xlu0 %v664_v16 }
 0x18f   : > { %695 = vadd.xlane.f32.xlu2 %v671_v26 }
 0x197   : > { %689 = vadd.xlane.f32.xlu2 %v668_v34 }
 0x19f   : > { %683 = vadd.xlane.f32.xlu2 %v665_v62 }
 0x1d2   : > { %v704_v3 = vpop.xlane.xlu1 %703 }
 0x1d3   : > { %v1554_v35 = vmax.f32 %v704_v3, 1e-24 }
 0x1d5   : > { %1173 = vrsqrt.f32 %v1554_v35  ;;  %vm853_vm8 = vweird.f32 %v1554_v35 }
 0x1da   : > { %v706_v4 = vpop.xlane.xlu0 %705  ;;  %v698_v9 = vpop.xlane.xlu1 %697 }
 0x1db   : > { %v1557_v5 = vmax.f32 %v706_v4, 1e-24  ;;  %v1559_v6 = vpop.eup %1173  ;;  %v1564_v11 = vmax.f32 %v698_v9, 1e-24  ;;  %v420_v9 = vadd.s32 104, %v1588_v30 }
 0x1dc   : > { %v848_v43 = vmul.f32 %v1559_v6, %v1554_v35  ;;  %vm854_vm14 = vweird.f32 %v1559_v6 }
 0x1dd   : > { %1175 = vrsqrt.f32 %v1557_v5  ;;  %vm438_vm6 = vcmp.eq.s32.totalorder %v420_v9, %v1586_v28  ;;  %vm863_vm11 = vweird.f32 %v1557_v5  ;;  %vm1651_vm12 = vmor %vm853_vm8, %vm854_vm14 }
 0x1de   : > { %v849_v13 = vmul.f32 %v1559_v6, %v848_v43  ;;  %v1269_v43 = vmov 1.0  }
 0x1df   : > { %1078 = vmatpush.msk.msrb.mxu1 %vm440_vm3, %v1269_v43 }
 0x1e0   : > { %v850_v19 = vmul.f32 0.5, %v849_v13 }
 0x1e1   : > { %1079 = vmatpush.msk.msrb.mxu1 %vm439_vm4, %v1269_v43 }
 0x1e2   : > { %v700_v10 = vpop.xlane.xlu0 %699  ;;  %v692_v23 = vpop.xlane.xlu1 %691  ;;  %v851_v25 = vsub.f32 1.5, %v850_v19 }
 0x1e3   : > { %v1566_v12 = vpop.eup %1175  ;;  %v1569_v14 = vmax.f32 %v700_v10, 1e-24  ;;  %v1592_v32 = vmax.f32 %v692_v23, 1e-24  ;;  %1080 = vmatpush.msk.msrb.mxu1 %vm438_vm6, %v1269_v43 }
 0x1e4   : > { %v858_v18 = vmul.f32 %v1566_v12, %v1557_v5  ;;  %vm864_vm0 = vweird.f32 %v1566_v12  ;;  %v1607_v42 = vmul.f32 %v1559_v6, %v851_v25 }
 0x1e5   : > { %vm833_vm8 = vweird.f32 %v1569_v14 }
 0x1e6   : > { %v859_v22 = vmul.f32 %v1566_v12, %v858_v18 }
 0x1e8   : > { %v860_v38 = vmul.f32 0.5, %v859_v22 }
 0x1ea   : > { %v710_v7 = vpop.xlane.xlu2 %709  ;;  %v694_v33 = vpop.xlane.xlu0 %693  ;;  %v861_v3 = vsub.f32 1.5, %v860_v38  ;;  %v417_v38 = vadd.s32 80, %v1588_v30 }
 0x1eb   : > { %v726_v8 = vmax.f32 %v710_v7, 1e-24  ;;  %v1609_v44 = vmax.f32 %v694_v33, 1e-24  ;;  %v686_v33 = vpop.xlane.xlu1 %685 }
 0x1ec   : > { %v862_v23 = vmul.f32 %v1566_v12, %v861_v3  ;;  %vm435_vm14 = vcmp.eq.s32.totalorder %v417_v38, %v1586_v28  ;;  %v1682_v0 = vmax.f32 %v686_v33, 1e-24 }
 0x1ed   : > { %1177 = vrsqrt.f32 %v726_v8  ;;  %vm883_vm1 = vweird.f32 %v726_v8 }
 0x1ee   : > { %1179 = vrsqrt.f32 %v1564_v11 }
 0x1f2   : > { %v708_v15 = vpop.xlane.xlu2 %707 }
 0x1f3   : > { %v1571_v16 = vmax.f32 %v708_v15, 1e-24  ;;  %v1178_v17 = vpop.eup %1177 }
 0x1f4   : > { %v878_v20 = vmul.f32 %v1178_v17, %v726_v8  ;;  %v1579_v27 = vpop.eup %1179  ;;  %vm884_vm15 = vweird.f32 %v1178_v17 }
 0x1f5   : > { %1181 = vrsqrt.f32 %v1571_v16  ;;  %v818_v41 = vmul.f32 %v1579_v27, %v1564_v11  ;;  %vm885_vm2 = vmor %vm883_vm1, %vm884_vm15  ;;  %vm873_vm7 = vweird.f32 %v1571_v16 }
 0x1f6   : > { %1183 = vrsqrt.f32 %v1569_v14  ;;  %v879_v21 = vmul.f32 %v1178_v17, %v878_v20  ;;  %v418_v20 = vadd.s32 88, %v1588_v30  ;;  %vm1662_vm15 = vmor %vm863_vm11, %vm864_vm0  ;;  %vm824_vm11 = vweird.f32 %v1579_v27 }
 0x1f7   : > { %v819_v10 = vmul.f32 %v1579_v27, %v818_v41  ;;  %v866_v41 = vsel %vm1662_vm15, %v1566_v12, %v862_v23 }
 0x1f8   : > { %v880_v26 = vmul.f32 0.5, %v879_v21  ;;  %vm436_vm13 = vcmp.eq.s32.totalorder %v418_v20, %v1586_v28 }
 0x1f9   : > { %v1640_v24 = vmul.f32 0.5, %v819_v10  ;;  %v900_v10 = vmul.f32 %v866_v41, %v1460_v58  ;;  %v413_v58 = vadd.s32 48, %v1588_v30 }
 0x1fa   : > { %v702_v29 = vpop.xlane.xlu2 %701  ;;  %v881_v36 = vsub.f32 1.5, %v880_v26 }
 0x1fb   : > { %v1590_v31 = vpop.eup %1181  ;;  %v1594_v34 = vmax.f32 %v702_v29, 1e-24 }
 0x1fc   : > { %v1597_v37 = vpop.eup %1183  ;;  %v868_v39 = vmul.f32 %v1590_v31, %v1571_v16  ;;  %v882_v60 = vmul.f32 %v1178_v17, %v881_v36  ;;  %vm874_vm5 = vweird.f32 %v1590_v31  ;;  %v688_v36 = vpop.xlane.xlu0 %687 }
 0x1fd   : > { %1185 = vrsqrt.f32 %v1594_v34  ;;  %v828_v62 = vmul.f32 %v1597_v37, %v1569_v14  ;;  %vm875_vm9 = vmor %vm873_vm7, %vm874_vm5  ;;  %v1684_v12 = vmax.f32 %v688_v36, 1e-24  ;;  %vm843_vm4 = vweird.f32 %v1594_v34 }
 0x1fe   : > { %v869_v59 = vmul.f32 %v1590_v31, %v868_v39  ;;  %v886_v7 = vsel %vm885_vm2, %v1178_v17, %v882_v60  ;;  %1187 = vrsqrt.f32 %v1592_v32  ;;  %v419_v17 = vadd.s32 96, %v1588_v30 }
 0x1ff   : > { %v902_v8 = vmul.f32 %v886_v7, %v1474_v1  ;;  %v829_v19 = vmul.f32 %v1597_v37, %v828_v62  ;;  %1189 = vrsqrt.f32 %v1609_v44  ;;  %v416_v39 = vadd.s32 72, %v1588_v30 }
 0x200   : > { %v870_v4 = vmul.f32 0.5, %v869_v59  ;;  %vm437_vm10 = vcmp.eq.s32.totalorder %v419_v17, %v1586_v28  ;;  %v821_v60 = vsub.f32 1.5, %v1640_v24  ;;  %v415_v62 = vadd.s32 64, %v1588_v30 }
 0x201   : > { %903 = vmatpush.xpose.msra.mxu3 %v902_v8  ;;  %1081 = vmatpush.msk.msrb.mxu1 %vm437_vm10, %v1269_v43  ;;  %v830_v29 = vmul.f32 0.5, %v829_v19  ;;  %vm434_vm0 = vcmp.eq.s32.totalorder %v416_v39, %v1586_v28  ;;  %v412_v17 = vadd.s32 40, %v1588_v30  ;;  %vm834_vm6 = vweird.f32 %v1597_v37 }
 0x202   : > { %v871_v13 = vsub.f32 1.5, %v870_v4  ;;  %v696_v15 = vpop.xlane.xlu2 %695  ;;  %vm433_vm1 = vcmp.eq.s32.totalorder %v415_v62, %v1586_v28  ;;  %vm431_vm7 = vcmp.eq.s32.totalorder %v413_v58, %v1586_v28  ;;  %vm1734_vm10 = vmor %vm833_vm8, %vm834_vm6  ;;  %v822_v33 = vmul.f32 %v1579_v27, %v821_v60 }
 0x203   : > { %v1626_v18 = vpop.eup %1185  ;;  %v1630_v1 = vmax.f32 %v696_v15, 1e-24  ;;  %1082 = vmatpush.msk.msrb.mxu1 %vm436_vm13, %v1269_v43  ;;  %v831_v7 = vsub.f32 1.5, %v830_v29  ;;  %vm823_vm13 = vweird.f32 %v1564_v11  ;;  %v409_v11 = vadd.s32 16, %v1588_v30 }
 0x204   : > { %v838_v21 = vmul.f32 %v1626_v18, %v1594_v34  ;;  %v872_v22 = vmul.f32 %v1590_v31, %v871_v13  ;;  %v1657_v35 = vpop.eup %1187  ;;  %vm844_vm2 = vweird.f32 %v1626_v18  ;;  %vm1762_vm15 = vmor %vm823_vm13, %vm824_vm11  ;;  %vm773_vm13 = vweird.f32 %v1684_v12 }
 0x205   : > { %1191 = vrsqrt.f32 %v1630_v1  ;;  %v1676_v59 = vpop.eup %1189  ;;  %1083 = vmatpush.msk.msrb.mxu1 %vm435_vm14, %v1269_v43  ;;  %v788_v19 = vmul.f32 %v1657_v35, %v1592_v32  ;;  %vm1714_vm5 = vmor %vm843_vm4, %vm844_vm2  ;;  %v832_v23 = vmul.f32 %v1597_v37, %v831_v7  ;;  %vm794_vm8 = vweird.f32 %v1657_v35 }
 0x206   : > { %v839_v16 = vmul.f32 %v1626_v18, %v838_v21  ;;  %v876_v25 = vsel %vm875_vm9, %v1590_v31, %v872_v22  ;;  %v798_v8 = vmul.f32 %v1676_v59, %v1609_v44  ;;  %vm430_vm9 = vcmp.eq.s32.totalorder %v412_v17, %v1586_v28  ;;  %v400_v17 = vpop.f32.mrf.mxu1 }
 0x207   : > { %v901_v5 = vmul.f32 %v876_v25, %v1470_v63  ;;  %v856_v63 = vsel %vm1651_vm12, %v1559_v6, %v1607_v42  ;;  %v414_v6 = vadd.s32 56, %v1588_v30  ;;  %1084 = vmatpush.msk.msrb.mxu1 %vm434_vm0, %v1269_v43  ;;  %v410_v25 = vadd.s32 24, %v1588_v30 }
 0x208   : > { %v840_v40 = vmul.f32 0.5, %v839_v16  ;;  %v899_v21 = vmul.f32 %v856_v63, %v1454_v55  ;;  %v799_v24 = vmul.f32 %v1676_v59, %v798_v8  ;;  %v411_v55 = vadd.s32 32, %v1588_v30 }
 0x209   : > { %904 = vmatpush.xpose.msra.mxu3 %v901_v5  ;;  %vm432_vm3 = vcmp.eq.s32.totalorder %v414_v6, %v1586_v28  ;;  %1085 = vmatpush.msk.msrb.mxu1 %vm433_vm1, %v1269_v43  ;;  %v789_v26 = vmul.f32 %v1657_v35, %v788_v19  ;;  %v836_v31 = vsel %vm1734_vm10, %v1597_v37, %v832_v23  ;;  %v408_v37 = vadd.s32 8, %v1588_v30  ;;  %v680_v6 = vpop.xlane.xlu1 %679 }
 0x20a   : > { %v841_v3 = vsub.f32 1.5, %v840_v40  ;;  %v690_v4 = vpop.xlane.xlu2 %689  ;;  %vm429_vm12 = vcmp.eq.s32.totalorder %v411_v55, %v1586_v28  ;;  %v800_v39 = vmul.f32 0.5, %v799_v24  ;;  %v682_v40 = vpop.xlane.xlu0 %681  ;;  %vm428_vm14 = vcmp.eq.s32.totalorder %v410_v25, %v1586_v28 }
 0x20b   : > { %v1688_v42 = vpop.eup %1191  ;;  %v1690_v9 = vmax.f32 %v690_v4, 1e-24  ;;  %1086 = vmatpush.msk.msrb.mxu1 %vm432_vm3, %v1269_v43  ;;  %v790_v60 = vmul.f32 0.5, %v789_v26  ;;  %v897_v62 = vmul.f32 %v836_v31, %v1448_v52  ;;  %v1778_v7 = vmax.f32 %v682_v40, 1e-24 }
 0x20c   : > { %v808_v13 = vmul.f32 %v1688_v42, %v1630_v1  ;;  %v842_v15 = vmul.f32 %v1626_v18, %v841_v3  ;;  %v826_v3 = vsel %vm1762_vm15, %v1579_v27, %v822_v33  ;;  %vm427_vm0 = vcmp.eq.s32.totalorder %v409_v11, %v1586_v28 }
 0x20d   : > { %1193 = vrsqrt.f32 %v1690_v9  ;;  %905 = vmatpush.xpose.msra.mxu3 %v900_v10  ;;  %1087 = vmatpush.msk.msrb.mxu1 %vm431_vm7, %v1269_v43  ;;  %v801_v52 = vsub.f32 1.5, %v800_v39  ;;  %vm814_vm1 = vweird.f32 %v1688_v42  ;;  %vm426_vm2 = vcmp.eq.s32.totalorder %v408_v37, %v1586_v28 }
 0x20e   : > { %1195 = vrsqrt.f32 %v1684_v12  ;;  %v809_v20 = vmul.f32 %v1688_v42, %v808_v13  ;;  %v846_v34 = vsel %vm1714_vm5, %v1626_v18, %v842_v15  ;;  %v791_v13 = vsub.f32 1.5, %v790_v60 }
 0x20f   : > { %1197 = vrsqrt.f32 %v1682_v0  ;;  %v898_v5 = vmul.f32 %v846_v34, %v1450_v53  ;;  %1088 = vmatpush.msk.msrb.mxu1 %vm430_vm9, %v1269_v43  ;;  %v1791_v15 = vmax.f32 %v680_v6, 1e-24  ;;  %vm813_vm3 = vweird.f32 %v1630_v1 }
 0x210   : > { %v810_v16 = vmul.f32 0.5, %v809_v20  ;;  %v896_v58 = vmul.f32 %v826_v3, %v1444_v50  ;;  %vm1800_vm4 = vmor %vm813_vm3, %vm814_vm1  ;;  %vm425_vm5 = vcmp.eq.s32.totalorder %v1588_v30, %v1586_v28  ;;  %v802_v22 = vmul.f32 %v1676_v59, %v801_v52 }
 0x211   : > { %906 = vmatpush.xpose.msra.mxu3 %v899_v21  ;;  %1089 = vmatpush.msk.msrb.mxu1 %vm429_vm12, %v1269_v43  ;;  %vm804_vm6 = vweird.f32 %v1676_v59  ;;  %vm793_vm7 = vweird.f32 %v1592_v32  ;;  %vm803_vm9 = vweird.f32 %v1609_v44  ;;  %v792_v28 = vmul.f32 %v1657_v35, %v791_v13 }
 0x212   : > { %v684_v29 = vpop.xlane.xlu2 %683  ;;  %v811_v41 = vsub.f32 1.5, %v810_v16  ;;  %vm805_vm10 = vmor %vm803_vm9, %vm804_vm6  ;;  %vm783_vm15 = vweird.f32 %v1690_v9  ;;  %vm743_vm9 = vweird.f32 %v1778_v7 }
 0x213   : > { %v1743_v14 = vpop.eup %1193  ;;  %v1745_v36 = vmax.f32 %v684_v29, 1e-24  ;;  %1090 = vmatpush.msk.msrb.mxu1 %vm428_vm14, %v1269_v43  ;;  %v806_v55 = vsel %vm805_vm10, %v1676_v59, %v802_v22  ;;  %vm1829_vm11 = vmor %vm793_vm7, %vm794_vm8 }
 0x214   : > { %v1752_v38 = vpop.eup %1195  ;;  %v778_v63 = vmul.f32 %v1743_v14, %v1690_v9  ;;  %v812_v27 = vmul.f32 %v1688_v42, %v811_v41  ;;  %v894_v26 = vmul.f32 %v806_v55, %v1436_v46  ;;  %v796_v29 = vsel %vm1829_vm11, %v1657_v35, %v792_v28 }
 0x215   : > { %907 = vmatpush.xpose.msra.mxu3 %v898_v5  ;;  %v768_v4 = vmul.f32 %v1752_v38, %v1684_v12  ;;  %1199 = vrsqrt.f32 %v1745_v36  ;;  %v1782_v10 = vpop.eup %1197  ;;  %1091 = vmatpush.msk.msrb.mxu1 %vm427_vm0, %v1269_v43  ;;  %vm784_vm12 = vweird.f32 %v1743_v14  ;;  %v403_v5 = vpop.f32.mrf.mxu1  ;;  %vm774_vm14 = vweird.f32 %v1752_v38 }
 0x216   : > { %v779_v8 = vmul.f32 %v1743_v14, %v778_v63  ;;  %v758_v19 = vmul.f32 %v1782_v10, %v1682_v0  ;;  %1201 = vrsqrt.f32 %v1778_v7  ;;  %v816_v50 = vsel %vm1800_vm4, %v1688_v42, %v812_v27  ;;  %vm785_vm0 = vmor %vm783_vm15, %vm784_vm12 }
 0x217   : > { %v769_v20 = vmul.f32 %v1752_v38, %v768_v4  ;;  %1092 = vmatpush.msk.msrb.mxu1 %vm426_vm2, %v1269_v43  ;;  %1203 = vrsqrt.f32 %v1791_v15  ;;  %v895_v24 = vmul.f32 %v816_v50, %v1440_v48  ;;  %v893_v31 = vmul.f32 %v796_v29, %v1466_v61  ;;  %vm775_vm1 = vmor %vm773_vm13, %vm774_vm14 }
 0x218   : > { %v780_v1 = vmul.f32 0.5, %v779_v8  ;;  %v759_v30 = vmul.f32 %v1782_v10, %v758_v19  ;;  %vm763_vm2 = vweird.f32 %v1682_v0  ;;  %vm764_vm3 = vweird.f32 %v1782_v10 }
 0x219   : > { %908 = vmatpush.xpose.msra.mxu3 %v897_v62  ;;  %1093 = vmatpush.msk.msrb.mxu1 %vm425_vm5, %v1269_v43  ;;  %v770_v42 = vmul.f32 0.5, %v769_v20  ;;  %vm765_vm4 = vmor %vm763_vm2, %vm764_vm3  ;;  %vm753_vm6 = vweird.f32 %v1745_v36  ;;  %vm733_vm12 = vweird.f32 %v1791_v15  ;;  %v929_v27 = vstv %s333_s22 }
 0x21a   : > { %489 = vmatmul.f32.vlgmr.msrb.gmra.mxu1 %v400_v17  ;;  %v781_v16 = vsub.f32 1.5, %v780_v1  ;;  %v760_v25 = vmul.f32 0.5, %v759_v30 }
 0x21b   : > { %v1814_v23 = vpop.eup %1199  ;;  %v771_v48 = vsub.f32 1.5, %v770_v42 }
 0x21c   : > { %v748_v34 = vmul.f32 %v1814_v23, %v1745_v36  ;;  %v1202_v43 = vpop.eup %1201  ;;  %v782_v32 = vmul.f32 %v1743_v14, %v781_v16  ;;  %v761_v46 = vsub.f32 1.5, %v760_v25  ;;  %vm754_vm5 = vweird.f32 %v1814_v23 }
 0x21d   : > { %909 = vmatpush.xpose.msra.mxu3 %v896_v58  ;;  %v1204_v18 = vpop.eup %1203  ;;  %v738_v33 = vmul.f32 %v1202_v43, %v1778_v7  ;;  %v772_v63 = vmul.f32 %v1752_v38, %v771_v48  ;;  %vm755_vm7 = vmor %vm753_vm6, %vm754_vm5  ;;  %vm744_vm8 = vweird.f32 %v1202_v43 }
 0x21e   : > { %v749_v59 = vmul.f32 %v1814_v23, %v748_v34  ;;  %v728_v35 = vmul.f32 %v1204_v18, %v1791_v15  ;;  %v786_v41 = vsel %vm785_vm0, %v1743_v14, %v782_v32  ;;  %v762_v37 = vmul.f32 %v1782_v10, %v761_v46  ;;  %vm745_vm10 = vmor %vm743_vm9, %vm744_vm8 }
 0x21f   : > { %v739_v39 = vmul.f32 %v1202_v43, %v738_v33  ;;  %v892_v9 = vmul.f32 %v786_v41, %v1458_v57  ;;  %v776_v61 = vsel %vm775_vm1, %v1752_v38, %v772_v63  ;;  %vm734_vm11 = vweird.f32 %v1204_v18 }
 0x220   : > { %v750_v40 = vmul.f32 0.5, %v749_v59  ;;  %v729_v12 = vmul.f32 %v1204_v18, %v728_v35  ;;  %v891_v60 = vmul.f32 %v776_v61, %v1452_v54  ;;  %v766_v3 = vsel %vm765_vm4, %v1782_v10, %v762_v37  ;;  %vm735_vm13 = vmor %vm733_vm12, %vm734_vm11 }
 0x221   : > { %910 = vmatpush.xpose.msra.mxu3 %v895_v24  ;;  %v740_v53 = vmul.f32 0.5, %v739_v39  ;;  %v890_v57 = vmul.f32 %v766_v3, %v1446_v51 }
 0x222   : > { %492 = vmatmul.f32.gmra.mxu1 %v403_v5  ;;  %v751_v11 = vsub.f32 1.5, %v750_v40  ;;  %v730_v14 = vmul.f32 0.5, %v729_v12 }
 0x223   : > { %v741_v62 = vsub.f32 1.5, %v740_v53 }
 0x224   : > { %v752_v0 = vmul.f32 %v1814_v23, %v751_v11  ;;  %v731_v38 = vsub.f32 1.5, %v730_v14 }
 0x225   : > { %911 = vmatpush.xpose.msra.mxu3 %v894_v26  ;;  %v742_v6 = vmul.f32 %v1202_v43, %v741_v62 }
 0x226   : > { %v756_v4 = vsel %vm755_vm7, %v1814_v23, %v752_v0  ;;  %v732_v52 = vmul.f32 %v1204_v18, %v731_v38 }
 0x227   : > { %v889_v54 = vmul.f32 %v756_v4, %v1442_v49  ;;  %v746_v10 = vsel %vm745_vm10, %v1202_v43, %v742_v6  ;;  %v926_v49 = vstv %s334_s15 }
 0x228   : > { %v888_v51 = vmul.f32 %v746_v10, %v1438_v47  ;;  %v736_v36 = vsel %vm735_vm13, %v1204_v18, %v732_v52 }
 0x229   : > { %912 = vmatpush.xpose.msra.mxu3 %v893_v31  ;;  %v887_v8 = vmul.f32 %v736_v36, %v1434_v45 }
 0x22d   : > { %913 = vmatpush.xpose.msra.mxu3 %v892_v9 }
 0x231   : > { %914 = vmatpush.xpose.msra.mxu3 %v891_v60 }
 0x235   : > { %915 = vmatpush.xpose.msra.mxu3 %v890_v57 }
 0x239   : > { %916 = vmatpush.xpose.msra.mxu3 %v889_v54 }
 0x23d   : > { %917 = vmatpush.xpose.msra.mxu3 %v888_v51 }
 0x241   : > { %918 = vmatpush.xpose.msra.mxu3 %v887_v8 }
 0x244   : > { %919 = vmatmul.f32.vlgmr.msra.gmra.mxu3 %v1545_v56 }
 0x24c   : > { %922 = vmatmul.f32.gmra.mxu3 %v1551_v2 }
 0x297   : > { %v490_v7 = vpop.f32.mrf.mxu1 }
 0x298   : > { %v927_v13 = vadd.f32 %v926_v49, %v490_v7 }
 0x29a   : > { %v930_v47 = vmul.f32 %v929_v27, %v927_v13 }
 0x29c   : > { %932 = vst [vmem:[%s314_s24] sm:$0xff] %v930_v47 }
 0x29f   : > { %v493_v15 = vpop.f32.mrf.mxu1 }
 0x2a0   : > { %v928_v58 = vadd.f32 %v926_v49, %v493_v15 }
 0x2a2   : > { %v931_v45 = vmul.f32 %v929_v27, %v928_v58 }
 0x2a4   : > { %933 = vst [vmem:[%s314_s24 + $0x10] sm:$0xff] %v931_v45 }
 0x2c7   : > { %v920_v17 = vpop.f32.mrf.mxu3 }
 0x2c8   : > { %v934_v56 = vadd.f32 %v926_v49, %v920_v17 }
 0x2ca   : > { %v936_v2 = vmul.f32 %v934_v56, %v929_v27 }
 0x2cc   : > { %938 = vst [vmem:[%s314_s24 + $0x8] sm:$0xff] %v936_v2 }
 0x2cf   : > { %v923_v19 = vpop.f32.mrf.mxu3 }
 0x2d0   : > { %v935_v20 = vadd.f32 %v926_v49, %v923_v19 }
 0x2d2   : > { %v937_v21 = vmul.f32 %v935_v20, %v929_v27 }
 0x2d4   : > { %939 = vst [vmem:[%s314_s24 + $0x18] sm:$0xff] %v937_v21 }
 0x2d5   : > { %1232 = shalt.err (!%p1229_p3)
}
 0x2d6   : > { %s1270_s21 = smov 256   ;;  %s1271_s23 = smov 16  }
 0x2d7   : > { %1122 = dma.vmem_to_hbm [thread:$0]  (%p1356_p5), %s954_s10, 512, %s956_s11, %s941_s16, %s1270_s21, %s1270_s21, %s1271_s23  }
 0x2d8 PF: > { %p1128_p4 = scmp.ge.s32.totalorder %s1267_s8, 2  ;;  %s970_s24 = sand.u32 1, %s1255_s28  }
 0x2d9   : > { %s971_s25 = scalar_lea.sflag [#allocation5], %s970_s24 }
 0x2da   : > { %p1125_p7 = pnand %p1128_p4, %p1360_p6 }
 0x2dc   : > { %p1126_p8 = pneg %p1125_p7 }
 0x2de   : > { %1250 = dma.done.wait (%p1126_p8), %s971_s25, 512  }
 0x2df   : > { %1252 = vsyncadd (%p1126_p8), %s971_s25, 4294966784  ;;  %p19_p9 = scmp.ge.s32.totalorder %s1343_s9, 4   ;;  %s1923_s28 = smov %s1259_s29 }
 0x2e0   : > { %s1924_s29 = smov %s1263_s30  ;;  %s1925_s30 = smov %s1354_s12 }
 0x2e1   : > { %s1926_s8 = smov %s1343_s9  ;;  %21 = sbr.rel (!%p19_p9) target bundleno = 6 (0x6), region = 92 }
 0x2e6   :  { %977 = vsyncpa [#allocation5], 1 }
 0x2e7   :  { %979 = vsyncpa [#allocation5 + $0x1], 1 }

</bundles_post_ra>
